<compile_context>
chip_gen: v5e
topology: v5e:2x2
jax: 0.10.0
libtpu: 0.0.40
codegen_flags: <defaults>
</compile_context>

<pallas_src>
import functools
import math

import jax
import jax.numpy as jnp
from jax.experimental import pallas as pl
from jax.experimental.pallas import tpu as pltpu


# ---------------------------------------------------------------------------
# Fused kernel: L decoder blocks (grid step 0) + one vocab-column tile per step
# ---------------------------------------------------------------------------
def _fused_decoder_kernel(x_ref, bidq_ref, keyid_ref,
                          wqkv_ref, wo_ref,
                          w1_ref, b1_ref, w2_ref, b2_ref,
                          g1_ref, be1_ref, g2_ref, be2_ref,
                          wout_ref, bout_ref,
                          o_ref, x_sc):
    j = pl.program_id(0)

    @pl.when(j == 0)
    def _run_decoder_stack():
        x = x_ref[...]                                   # [N, D] f32
        n_layers = wqkv_ref.shape[0]

        # Additive attention mask built once in-kernel (no [N,N] HBM DMA):
        # key j is visible to query i iff they share a sequence id and key j is
        # not a padding token (padded keys carry id -1, which never matches).
        bias = jnp.where(bidq_ref[...] == keyid_ref[...],
                         jnp.float32(0.0), jnp.float32(-1e9))       # [N, N]

        def layer_norm(v, g, b):
            # one-pass stats: var = E[v^2] - mu^2
            mu = jnp.mean(v, axis=-1, keepdims=True)
            ms = jnp.mean(v * v, axis=-1, keepdims=True)
            var = ms - mu * mu
            return (v - mu) * jax.lax.rsqrt(var + jnp.float32(1e-5)) * g + b

        def layer_body(l, x):
            xb = x.astype(jnp.bfloat16)
            # fused Q|K|V projection; 1/sqrt(dk) already folded into Q columns
            qkv = jnp.dot(xb, wqkv_ref[l],
                          preferred_element_type=jnp.float32)       # [N, 384]
            q = qkv[:, 0:128]        # lanes >= dk are zero (inert padding)
            k = qkv[:, 128:256]
            v = qkv[:, 256:384]

            scores = jax.lax.dot_general(
                q.astype(jnp.bfloat16), k.astype(jnp.bfloat16),
                (((1,), (1,)), ((), ())),
                preferred_element_type=jnp.float32)                 # [N, N]
            scores = scores + bias

            # online-style softmax with deferred normalization
            m = jnp.max(scores, axis=-1, keepdims=True)
            e = jnp.exp(scores - m)
            ssum = jnp.sum(e, axis=-1, keepdims=True)
            head = jnp.dot(e.astype(jnp.bfloat16), v.astype(jnp.bfloat16),
                           preferred_element_type=jnp.float32)      # [N, 128]
            head = head * pl.reciprocal(ssum, approx=True)

            # concat([head]*nhead) @ W_O == head @ W_O_eff (folded, zero-row padded)
            attn = jnp.dot(head.astype(jnp.bfloat16), wo_ref[l],
                           preferred_element_type=jnp.float32)      # [N, D]

            # residual + LayerNorm1 (dropout == identity in eval)
            h = layer_norm(attn + x, g1_ref[l], be1_ref[l])

            # feed-forward
            f = jnp.dot(h.astype(jnp.bfloat16), w1_ref[l],
                        preferred_element_type=jnp.float32) + b1_ref[l]
            f = jnp.maximum(f, jnp.float32(0.0))
            f = jnp.dot(f.astype(jnp.bfloat16), w2_ref[l],
                        preferred_element_type=jnp.float32) + b2_ref[l]

            # residual + LayerNorm2
            return layer_norm(f + h, g2_ref[l], be2_ref[l])

        x = jax.lax.fori_loop(0, n_layers, layer_body, x, unroll=True)
        x_sc[...] = x                                    # carry across vocab tiles

    # every grid step: one lane-dense vocab-column tile of the final projection
    o_ref[...] = (jnp.dot(x_sc[...].astype(jnp.bfloat16), wout_ref[...],
                          preferred_element_type=jnp.float32)
                  + bout_ref[...])


# ---------------------------------------------------------------------------
# One-time (host-side) weight preprocessing — hoisted out of the jitted forward
# ---------------------------------------------------------------------------
def positional_encoding(seq_len, d_model):
    pos = jnp.arange(seq_len, dtype=jnp.float32)[:, None]
    i = jnp.arange(0, d_model, 2, dtype=jnp.float32)
    div = jnp.exp(-math.log(10000.0) * i / d_model)
    pe = jnp.zeros((seq_len, d_model), jnp.float32)
    pe = pe.at[:, 0::2].set(jnp.sin(pos * div))
    pe = pe.at[:, 1::2].set(jnp.cos(pos * div))
    return pe


def preprocess_params(params, nhead, max_seq_len):
    """Stack / pad / fold weights once; returns device arrays only."""
    d_model = params["emb"].shape[1]
    dk = d_model // nhead
    V = params["out_w"].shape[1]
    blocks = params["blocks"]
    scale = 1.0 / math.sqrt(dk)

    def pad_qkv(b):
        m = jnp.zeros((d_model, 3 * 128), jnp.float32)
        m = m.at[:, 0:dk].set(b["wq"] * scale)          # fold 1/sqrt(dk) into Q
        m = m.at[:, 128:128 + dk].set(b["wk"])
        m = m.at[:, 256:256 + dk].set(b["wv"])
        return m

    def fold_wo(b):
        # concat of identical heads @ W_O == head @ sum of W_O row-blocks
        wo_eff = b["wo"].reshape(nhead, dk, d_model).sum(0)
        return jnp.zeros((128, d_model), jnp.float32).at[:dk, :].set(wo_eff)

    prep = {
        "wqkv": jnp.stack([pad_qkv(b) for b in blocks]).astype(jnp.bfloat16),
        "wo":   jnp.stack([fold_wo(b) for b in blocks]).astype(jnp.bfloat16),
        "w1":   jnp.stack([b["w1"] for b in blocks]).astype(jnp.bfloat16),
        "b1":   jnp.stack([b["b1"] for b in blocks]),
        "w2":   jnp.stack([b["w2"] for b in blocks]).astype(jnp.bfloat16),
        "b2":   jnp.stack([b["b2"] for b in blocks]),
        "g1":   jnp.stack([b["g1"] for b in blocks]),
        "be1":  jnp.stack([b["be1"] for b in blocks]),
        "g2":   jnp.stack([b["g2"] for b in blocks]),
        "be2":  jnp.stack([b["be2"] for b in blocks]),
        "emb":  params["emb"].astype(jnp.float32),
        "pe":   positional_encoding(max_seq_len, d_model),
    }

    # lane-dense vocab projection, padded to a multiple of the vocab tile width
    Vp = ((V + 127) // 128) * 128
    TV = Vp if Vp <= 512 else 512
    Vp = ((Vp + TV - 1) // TV) * TV
    prep["wout"] = (jnp.zeros((d_model, Vp), jnp.float32)
                    .at[:, :V].set(params["out_w"]).astype(jnp.bfloat16))
    prep["bout"] = jnp.zeros((1, Vp), jnp.float32).at[:, :V].set(params["out_b"])
    return prep


# ---------------------------------------------------------------------------
# Jitted forward: embedding gather + tiny per-token metadata + one pallas_call
# ---------------------------------------------------------------------------
def tiny_transformer_decoder(tokens, prep, *, vocab):
    B, S = tokens.shape
    D = prep["emb"].shape[1]
    F = prep["w1"].shape[2]
    N = B * S
    Vp = prep["wout"].shape[1]
    TV = Vp if Vp <= 512 else 512

    # embedding gather + positional encoding (plain-JAX glue)
    x = (prep["emb"][tokens] + prep["pe"][:S][None]).reshape(N, D).astype(jnp.float32)

    # per-token metadata for the in-kernel attention mask (no [N,N] bias in HBM)
    bid = jnp.repeat(jnp.arange(B, dtype=jnp.int32), S)
    bidq = bid.astype(jnp.float32).reshape(N, 1)                      # query seq ids
    keyid = jnp.where(tokens.reshape(-1) == 0, -1, bid)               # pad keys -> -1
    keyid = keyid.astype(jnp.float32).reshape(1, N)

    inputs = (x, bidq, keyid,
              prep["wqkv"], prep["wo"],
              prep["w1"], prep["b1"], prep["w2"], prep["b2"],
              prep["g1"], prep["be1"], prep["g2"], prep["be2"])

    def full_spec(a):
        return pl.BlockSpec(a.shape, lambda j, nd=a.ndim: (0,) * nd)

    in_specs = [full_spec(a) for a in inputs] + [
        pl.BlockSpec((D, TV), lambda j: (0, j)),          # wout column tile
        pl.BlockSpec((1, TV), lambda j: (0, j)),          # bout column tile
    ]
    out_spec = pl.BlockSpec((N, TV), lambda j: (0, j))

    # scoped-VMEM budget sized from the actual resident footprint
    resident = 2 * sum(int(a.size) * a.dtype.itemsize for a in inputs)
    resident += 2 * (D * TV * 2 + TV * 4 + N * TV * 4)    # double-buffered vocab tiles
    resident += N * D * 4                                  # x carry scratch
    wmax = max(3 * 128, F, D, 128)
    temps = 8 * N * N * 4 + 6 * N * wmax * 4               # scores/exp + qkv/ffn temps
    vmem_limit = int(min(resident + temps + (4 << 20), 100 * 1024 * 1024))

    out = pl.pallas_call(
        _fused_decoder_kernel,
        out_shape=jax.ShapeDtypeStruct((N, Vp), jnp.float32),
        grid_spec=pltpu.PrefetchScalarGridSpec(
            num_scalar_prefetch=0,
            grid=(Vp // TV,),
            in_specs=in_specs,
            out_specs=out_spec,
            scratch_shapes=[pltpu.VMEM((N, D), jnp.float32)]),
        compiler_params=pltpu.CompilerParams(
            dimension_semantics=("arbitrary",),
            vmem_limit_bytes=vmem_limit),
    )(*inputs, prep["wout"], prep["bout"])

    return out[:, :vocab].reshape(B, S, vocab)


# ---------------------------------------------------------------------------
# Parameter init (matches the PyTorch module's parameter shapes/semantics)
# ---------------------------------------------------------------------------
def init_params(key, vocab, d_model, nhead, n_layers, dim_ff):
    dk = d_model // nhead
    keys = jax.random.split(key, 2 + n_layers)
    params = {
        "emb": jax.random.normal(keys[0], (vocab, d_model), jnp.float32),
        "out_w": jax.random.normal(keys[1], (d_model, vocab), jnp.float32)
                 / math.sqrt(d_model),
        "out_b": jnp.zeros((1, vocab), jnp.float32),
        "blocks": [],
    }
    for l in range(n_layers):
        k = jax.random.split(keys[2 + l], 6)
        params["blocks"].append(dict(
            wq=jax.random.normal(k[0], (d_model, dk), jnp.float32),
            wk=jax.random.normal(k[1], (d_model, dk), jnp.float32),
            wv=jax.random.normal(k[2], (d_model, dk), jnp.float32),
            wo=jax.random.normal(k[3], (d_model, d_model), jnp.float32),
            w1=jax.random.normal(k[4], (d_model, dim_ff), jnp.float32)
               / math.sqrt(d_model),
            b1=jnp.zeros((1, dim_ff), jnp.float32),
            w2=jax.random.normal(k[5], (dim_ff, d_model), jnp.float32)
               / math.sqrt(dim_ff),
            b2=jnp.zeros((1, d_model), jnp.float32),
            g1=jnp.ones((1, d_model), jnp.float32),
            be1=jnp.zeros((1, d_model), jnp.float32),
            g2=jnp.ones((1, d_model), jnp.float32),
            be2=jnp.zeros((1, d_model), jnp.float32),
        ))
    return params


# ---------------------------------------------------------------------------
if __name__ == "__main__":
    B, S = 2, 8
    vocab_size, d_model, nhead, n_layers, dim_ff = 32, 32, 4, 2, 64
    max_seq_len = 16

    key = jax.random.PRNGKey(0)
    pkey, tkey = jax.random.split(key)
    params = init_params(pkey, vocab_size, d_model, nhead, n_layers, dim_ff)

    # one-time preprocessing (outside the per-call jit path)
    prep = preprocess_params(params, nhead, max_seq_len)

    tokens = jax.random.randint(tkey, (B, S), 0, vocab_size, dtype=jnp.int32)
    tokens = tokens.at[:, -2:].set(0)   # force some padding positions

    fwd = jax.jit(functools.partial(tiny_transformer_decoder, vocab=vocab_size))
    out = fwd(tokens, prep)
    jax.block_until_ready(out)
    assert out.shape == (B, S, vocab_size) and out.dtype == jnp.float32
    assert bool(jnp.all(jnp.isfinite(out)))
    print("KERNEL_OK")
</pallas_src>

<mosaic_0001>
module attributes {stable_mosaic.version = 11 : i64} {
  func.func @_fused_decoder_kernel(%arg0: i32, %arg1: memref<16x32xf32, #tpu.memory_space<vmem>>, %arg2: memref<16x1xf32, #tpu.memory_space<vmem>>, %arg3: memref<1x16xf32, #tpu.memory_space<vmem>>, %arg4: memref<2x32x384xbf16, #tpu.memory_space<vmem>>, %arg5: memref<2x128x32xbf16, #tpu.memory_space<vmem>>, %arg6: memref<2x32x64xbf16, #tpu.memory_space<vmem>>, %arg7: memref<2x1x64xf32, #tpu.memory_space<vmem>>, %arg8: memref<2x64x32xbf16, #tpu.memory_space<vmem>>, %arg9: memref<2x1x32xf32, #tpu.memory_space<vmem>>, %arg10: memref<2x1x32xf32, #tpu.memory_space<vmem>>, %arg11: memref<2x1x32xf32, #tpu.memory_space<vmem>>, %arg12: memref<2x1x32xf32, #tpu.memory_space<vmem>>, %arg13: memref<2x1x32xf32, #tpu.memory_space<vmem>>, %arg14: memref<32x128xbf16, #tpu.memory_space<vmem>>, %arg15: memref<1x128xf32, #tpu.memory_space<vmem>>, %arg16: memref<16x128xf32, #tpu.memory_space<vmem>>, %arg17: memref<16x32xf32, #tpu.memory_space<vmem>>) attributes {dimension_semantics = [#tpu.dimension_semantics<arbitrary>], iteration_bounds = array<i64: 1>, scalar_prefetch = 0 : i64, scratch_operands = 1 : i64, tpu.core_type = #tpu.core_type<tc>, window_params = [{pipeline_mode = #tpu.pipeline_mode<synchronous>, transform_indices = @transform_0, window_bounds = array<i64: 16, 32>}, {pipeline_mode = #tpu.pipeline_mode<synchronous>, transform_indices = @transform_1, window_bounds = array<i64: 16, 1>}, {pipeline_mode = #tpu.pipeline_mode<synchronous>, transform_indices = @transform_2, window_bounds = array<i64: 1, 16>}, {pipeline_mode = #tpu.pipeline_mode<synchronous>, transform_indices = @transform_3, window_bounds = array<i64: 2, 32, 384>}, {pipeline_mode = #tpu.pipeline_mode<synchronous>, transform_indices = @transform_4, window_bounds = array<i64: 2, 128, 32>}, {pipeline_mode = #tpu.pipeline_mode<synchronous>, transform_indices = @transform_5, window_bounds = array<i64: 2, 32, 64>}, {pipeline_mode = #tpu.pipeline_mode<synchronous>, transform_indices = @transform_6, window_bounds = array<i64: 2, 1, 64>}, {pipeline_mode = #tpu.pipeline_mode<synchronous>, transform_indices = @transform_7, window_bounds = array<i64: 2, 64, 32>}, {pipeline_mode = #tpu.pipeline_mode<synchronous>, transform_indices = @transform_8, window_bounds = array<i64: 2, 1, 32>}, {pipeline_mode = #tpu.pipeline_mode<synchronous>, transform_indices = @transform_9, window_bounds = array<i64: 2, 1, 32>}, {pipeline_mode = #tpu.pipeline_mode<synchronous>, transform_indices = @transform_10, window_bounds = array<i64: 2, 1, 32>}, {pipeline_mode = #tpu.pipeline_mode<synchronous>, transform_indices = @transform_11, window_bounds = array<i64: 2, 1, 32>}, {pipeline_mode = #tpu.pipeline_mode<synchronous>, transform_indices = @transform_12, window_bounds = array<i64: 2, 1, 32>}, {transform_indices = @transform_13, window_bounds = array<i64: 32, 128>}, {transform_indices = @transform_14, window_bounds = array<i64: 1, 128>}, {transform_indices = @transform_15, window_bounds = array<i64: 16, 128>}]} {
    %c0_i32 = arith.constant 0 : i32
    %0 = arith.cmpi eq, %arg0, %c0_i32 : i32
    %1 = arith.extui %0 : i1 to i32
    %c0_i32_0 = arith.constant 0 : i32
    %2 = arith.cmpi ne, %1, %c0_i32_0 : i32
    scf.if %2 {
      %c0_8 = arith.constant 0 : index
      %c0_9 = arith.constant 0 : index
      %11 = vector.load %arg1[%c0_8, %c0_9] : memref<16x32xf32, #tpu.memory_space<vmem>>, vector<16x32xf32>
      %c0_10 = arith.constant 0 : index
      %c0_11 = arith.constant 0 : index
      %12 = vector.load %arg2[%c0_10, %c0_11] : memref<16x1xf32, #tpu.memory_space<vmem>>, vector<16x1xf32>
      %c0_12 = arith.constant 0 : index
      %c0_13 = arith.constant 0 : index
      %13 = vector.load %arg3[%c0_12, %c0_13] : memref<1x16xf32, #tpu.memory_space<vmem>>, vector<1x16xf32>
      %14 = vector.broadcast %12 : vector<16x1xf32> to vector<16x16xf32>
      %15 = vector.broadcast %13 : vector<1x16xf32> to vector<16x16xf32>
      %16 = arith.cmpf oeq, %14, %15 : vector<16x16xf32>
      %cst_14 = arith.constant 0.000000e+00 : f32
      %cst_15 = arith.constant -1.000000e+09 : f32
      %17 = vector.broadcast %cst_14 : f32 to vector<16x16xf32>
      %18 = vector.broadcast %cst_15 : f32 to vector<16x16xf32>
      %19 = arith.select %16, %17, %18 : vector<16x16xi1>, vector<16x16xf32>
      %c0_i32_16 = arith.constant 0 : i32
      %20 = arith.truncf %11 : vector<16x32xf32> to vector<16x32xbf16>
      %21 = arith.index_cast %c0_i32_16 : i32 to index
      %c0_17 = arith.constant 0 : index
      %c0_18 = arith.constant 0 : index
      %22 = vector.load %arg4[%21, %c0_17, %c0_18] : memref<2x32x384xbf16, #tpu.memory_space<vmem>>, vector<1x32x384xbf16>
      %23 = vector.shape_cast %22 : vector<1x32x384xbf16> to vector<32x384xbf16>
      %cst_19 = arith.constant dense<0.000000e+00> : vector<16x384xf32>
      %24 = tpu.matmul %20, %23, %cst_19 {dimension_numbers = #tpu.dot_dimension_numbers<[1], [0], [0], [1], [0, 0, 1, 1], [], []>} : vector<16x32xbf16>, vector<32x384xbf16>, vector<16x384xf32> -> vector<16x384xf32>
      %25 = vector.extract_strided_slice %24 {offsets = [0, 0], sizes = [16, 128], strides = [1, 1]} : vector<16x384xf32> to vector<16x128xf32>
      %26 = vector.extract_strided_slice %24 {offsets = [0, 128], sizes = [16, 128], strides = [1, 1]} : vector<16x384xf32> to vector<16x128xf32>
      %27 = vector.extract_strided_slice %24 {offsets = [0, 256], sizes = [16, 128], strides = [1, 1]} : vector<16x384xf32> to vector<16x128xf32>
      %28 = arith.truncf %25 : vector<16x128xf32> to vector<16x128xbf16>
      %29 = arith.truncf %26 : vector<16x128xf32> to vector<16x128xbf16>
      %cst_20 = arith.constant dense<0.000000e+00> : vector<16x16xf32>
      %30 = tpu.matmul %28, %29, %cst_20 {dimension_numbers = #tpu.dot_dimension_numbers<[1], [1], [0], [0], [0, 0, 1, 0], [], []>} : vector<16x128xbf16>, vector<16x128xbf16>, vector<16x16xf32> -> vector<16x16xf32>
      %31 = arith.addf %30, %19 : vector<16x16xf32>
      %cst_21 = arith.constant dense<0xFF800000> : vector<16xf32>
      %32 = vector.multi_reduction <maximumf>, %31, %cst_21 [1] : vector<16x16xf32> to vector<16xf32>
      %33 = vector.shape_cast %32 : vector<16xf32> to vector<16x1xf32>
      %34 = vector.broadcast %33 : vector<16x1xf32> to vector<16x16xf32>
      %35 = arith.subf %31, %34 : vector<16x16xf32>
      %36 = math.exp %35 : vector<16x16xf32>
      %cst_22 = arith.constant dense<0.000000e+00> : vector<16xf32>
      %37 = vector.multi_reduction <add>, %36, %cst_22 [1] : vector<16x16xf32> to vector<16xf32>
      %38 = vector.shape_cast %37 : vector<16xf32> to vector<16x1xf32>
      %39 = arith.truncf %36 : vector<16x16xf32> to vector<16x16xbf16>
      %40 = arith.truncf %27 : vector<16x128xf32> to vector<16x128xbf16>
      %cst_23 = arith.constant dense<0.000000e+00> : vector<16x128xf32>
      %41 = tpu.matmul %39, %40, %cst_23 {dimension_numbers = #tpu.dot_dimension_numbers<[1], [0], [0], [1], [0, 0, 1, 1], [], []>} : vector<16x16xbf16>, vector<16x128xbf16>, vector<16x128xf32> -> vector<16x128xf32>
      %42 = tpu.reciprocal %38 {approx = true} : vector<16x1xf32> -> vector<16x1xf32>
      %43 = vector.broadcast %42 : vector<16x1xf32> to vector<16x128xf32>
      %44 = arith.mulf %41, %43 : vector<16x128xf32>
      %45 = arith.truncf %44 : vector<16x128xf32> to vector<16x128xbf16>
      %46 = arith.index_cast %c0_i32_16 : i32 to index
      %c0_24 = arith.constant 0 : index
      %c0_25 = arith.constant 0 : index
      %47 = vector.load %arg5[%46, %c0_24, %c0_25] : memref<2x128x32xbf16, #tpu.memory_space<vmem>>, vector<1x128x32xbf16>
      %48 = vector.shape_cast %47 : vector<1x128x32xbf16> to vector<128x32xbf16>
      %cst_26 = arith.constant dense<0.000000e+00> : vector<16x32xf32>
      %49 = tpu.matmul %45, %48, %cst_26 {dimension_numbers = #tpu.dot_dimension_numbers<[1], [0], [0], [1], [0, 0, 1, 1], [], []>} : vector<16x128xbf16>, vector<128x32xbf16>, vector<16x32xf32> -> vector<16x32xf32>
      %50 = arith.addf %49, %11 : vector<16x32xf32>
      %51 = arith.index_cast %c0_i32_16 : i32 to index
      %c0_27 = arith.constant 0 : index
      %c0_28 = arith.constant 0 : index
      %52 = vector.load %arg10[%51, %c0_27, %c0_28] : memref<2x1x32xf32, #tpu.memory_space<vmem>>, vector<1x1x32xf32>
      %53 = vector.shape_cast %52 : vector<1x1x32xf32> to vector<1x32xf32>
      %54 = arith.index_cast %c0_i32_16 : i32 to index
      %c0_29 = arith.constant 0 : index
      %c0_30 = arith.constant 0 : index
      %55 = vector.load %arg11[%54, %c0_29, %c0_30] : memref<2x1x32xf32, #tpu.memory_space<vmem>>, vector<1x1x32xf32>
      %56 = vector.shape_cast %55 : vector<1x1x32xf32> to vector<1x32xf32>
      %cst_31 = arith.constant dense<0.000000e+00> : vector<16xf32>
      %57 = vector.multi_reduction <add>, %50, %cst_31 [1] : vector<16x32xf32> to vector<16xf32>
      %58 = vector.shape_cast %57 : vector<16xf32> to vector<16x1xf32>
      %cst_32 = arith.constant 3.200000e+01 : f32
      %59 = vector.broadcast %cst_32 : f32 to vector<16x1xf32>
      %60 = arith.divf %58, %59 : vector<16x1xf32>
      %61 = arith.mulf %50, %50 : vector<16x32xf32>
      %cst_33 = arith.constant dense<0.000000e+00> : vector<16xf32>
      %62 = vector.multi_reduction <add>, %61, %cst_33 [1] : vector<16x32xf32> to vector<16xf32>
      %63 = vector.shape_cast %62 : vector<16xf32> to vector<16x1xf32>
      %cst_34 = arith.constant 3.200000e+01 : f32
      %64 = vector.broadcast %cst_34 : f32 to vector<16x1xf32>
      %65 = arith.divf %63, %64 : vector<16x1xf32>
      %66 = arith.mulf %60, %60 : vector<16x1xf32>
      %67 = arith.subf %65, %66 : vector<16x1xf32>
      %68 = vector.broadcast %60 : vector<16x1xf32> to vector<16x32xf32>
      %69 = arith.subf %50, %68 : vector<16x32xf32>
      %cst_35 = arith.constant 9.99999974E-6 : f32
      %70 = vector.broadcast %cst_35 : f32 to vector<16x1xf32>
      %71 = arith.addf %67, %70 : vector<16x1xf32>
      %72 = math.rsqrt %71 : vector<16x1xf32>
      %73 = vector.broadcast %72 : vector<16x1xf32> to vector<16x32xf32>
      %74 = arith.mulf %69, %73 : vector<16x32xf32>
      %75 = vector.broadcast %53 : vector<1x32xf32> to vector<16x32xf32>
      %76 = arith.mulf %74, %75 : vector<16x32xf32>
      %77 = vector.broadcast %56 : vector<1x32xf32> to vector<16x32xf32>
      %78 = arith.addf %76, %77 : vector<16x32xf32>
      %79 = arith.truncf %78 : vector<16x32xf32> to vector<16x32xbf16>
      %80 = arith.index_cast %c0_i32_16 : i32 to index
      %c0_36 = arith.constant 0 : index
      %c0_37 = arith.constant 0 : index
      %81 = vector.load %arg6[%80, %c0_36, %c0_37] : memref<2x32x64xbf16, #tpu.memory_space<vmem>>, vector<1x32x64xbf16>
      %82 = vector.shape_cast %81 : vector<1x32x64xbf16> to vector<32x64xbf16>
      %cst_38 = arith.constant dense<0.000000e+00> : vector<16x64xf32>
      %83 = tpu.matmul %79, %82, %cst_38 {dimension_numbers = #tpu.dot_dimension_numbers<[1], [0], [0], [1], [0, 0, 1, 1], [], []>} : vector<16x32xbf16>, vector<32x64xbf16>, vector<16x64xf32> -> vector<16x64xf32>
      %84 = arith.index_cast %c0_i32_16 : i32 to index
      %c0_39 = arith.constant 0 : index
      %c0_40 = arith.constant 0 : index
      %85 = vector.load %arg7[%84, %c0_39, %c0_40] : memref<2x1x64xf32, #tpu.memory_space<vmem>>, vector<1x1x64xf32>
      %86 = vector.shape_cast %85 : vector<1x1x64xf32> to vector<1x64xf32>
      %87 = vector.broadcast %86 : vector<1x64xf32> to vector<16x64xf32>
      %88 = arith.addf %83, %87 : vector<16x64xf32>
      %cst_41 = arith.constant 0.000000e+00 : f32
      %89 = vector.broadcast %cst_41 : f32 to vector<16x64xf32>
      %90 = arith.maximumf %88, %89 : vector<16x64xf32>
      %91 = arith.truncf %90 : vector<16x64xf32> to vector<16x64xbf16>
      %92 = arith.index_cast %c0_i32_16 : i32 to index
      %c0_42 = arith.constant 0 : index
      %c0_43 = arith.constant 0 : index
      %93 = vector.load %arg8[%92, %c0_42, %c0_43] : memref<2x64x32xbf16, #tpu.memory_space<vmem>>, vector<1x64x32xbf16>
      %94 = vector.shape_cast %93 : vector<1x64x32xbf16> to vector<64x32xbf16>
      %cst_44 = arith.constant dense<0.000000e+00> : vector<16x32xf32>
      %95 = tpu.matmul %91, %94, %cst_44 {dimension_numbers = #tpu.dot_dimension_numbers<[1], [0], [0], [1], [0, 0, 1, 1], [], []>} : vector<16x64xbf16>, vector<64x32xbf16>, vector<16x32xf32> -> vector<16x32xf32>
      %96 = arith.index_cast %c0_i32_16 : i32 to index
      %c0_45 = arith.constant 0 : index
      %c0_46 = arith.constant 0 : index
      %97 = vector.load %arg9[%96, %c0_45, %c0_46] : memref<2x1x32xf32, #tpu.memory_space<vmem>>, vector<1x1x32xf32>
      %98 = vector.shape_cast %97 : vector<1x1x32xf32> to vector<1x32xf32>
      %99 = vector.broadcast %98 : vector<1x32xf32> to vector<16x32xf32>
      %100 = arith.addf %95, %99 : vector<16x32xf32>
      %101 = arith.addf %100, %78 : vector<16x32xf32>
      %102 = arith.index_cast %c0_i32_16 : i32 to index
      %c0_47 = arith.constant 0 : index
      %c0_48 = arith.constant 0 : index
      %103 = vector.load %arg12[%102, %c0_47, %c0_48] : memref<2x1x32xf32, #tpu.memory_space<vmem>>, vector<1x1x32xf32>
      %104 = vector.shape_cast %103 : vector<1x1x32xf32> to vector<1x32xf32>
      %105 = arith.index_cast %c0_i32_16 : i32 to index
      %c0_49 = arith.constant 0 : index
      %c0_50 = arith.constant 0 : index
      %106 = vector.load %arg13[%105, %c0_49, %c0_50] : memref<2x1x32xf32, #tpu.memory_space<vmem>>, vector<1x1x32xf32>
      %107 = vector.shape_cast %106 : vector<1x1x32xf32> to vector<1x32xf32>
      %cst_51 = arith.constant dense<0.000000e+00> : vector<16xf32>
      %108 = vector.multi_reduction <add>, %101, %cst_51 [1] : vector<16x32xf32> to vector<16xf32>
      %109 = vector.shape_cast %108 : vector<16xf32> to vector<16x1xf32>
      %cst_52 = arith.constant 3.200000e+01 : f32
      %110 = vector.broadcast %cst_52 : f32 to vector<16x1xf32>
      %111 = arith.divf %109, %110 : vector<16x1xf32>
      %112 = arith.mulf %101, %101 : vector<16x32xf32>
      %cst_53 = arith.constant dense<0.000000e+00> : vector<16xf32>
      %113 = vector.multi_reduction <add>, %112, %cst_53 [1] : vector<16x32xf32> to vector<16xf32>
      %114 = vector.shape_cast %113 : vector<16xf32> to vector<16x1xf32>
      %cst_54 = arith.constant 3.200000e+01 : f32
      %115 = vector.broadcast %cst_54 : f32 to vector<16x1xf32>
      %116 = arith.divf %114, %115 : vector<16x1xf32>
      %117 = arith.mulf %111, %111 : vector<16x1xf32>
      %118 = arith.subf %116, %117 : vector<16x1xf32>
      %119 = vector.broadcast %111 : vector<16x1xf32> to vector<16x32xf32>
      %120 = arith.subf %101, %119 : vector<16x32xf32>
      %cst_55 = arith.constant 9.99999974E-6 : f32
      %121 = vector.broadcast %cst_55 : f32 to vector<16x1xf32>
      %122 = arith.addf %118, %121 : vector<16x1xf32>
      %123 = math.rsqrt %122 : vector<16x1xf32>
      %124 = vector.broadcast %123 : vector<16x1xf32> to vector<16x32xf32>
      %125 = arith.mulf %120, %124 : vector<16x32xf32>
      %126 = vector.broadcast %104 : vector<1x32xf32> to vector<16x32xf32>
      %127 = arith.mulf %125, %126 : vector<16x32xf32>
      %128 = vector.broadcast %107 : vector<1x32xf32> to vector<16x32xf32>
      %129 = arith.addf %127, %128 : vector<16x32xf32>
      %c1_i32 = arith.constant 1 : i32
      %130 = arith.truncf %129 : vector<16x32xf32> to vector<16x32xbf16>
      %131 = arith.index_cast %c1_i32 : i32 to index
      %c0_56 = arith.constant 0 : index
      %c0_57 = arith.constant 0 : index
      %132 = vector.load %arg4[%131, %c0_56, %c0_57] : memref<2x32x384xbf16, #tpu.memory_space<vmem>>, vector<1x32x384xbf16>
      %133 = vector.shape_cast %132 : vector<1x32x384xbf16> to vector<32x384xbf16>
      %cst_58 = arith.constant dense<0.000000e+00> : vector<16x384xf32>
      %134 = tpu.matmul %130, %133, %cst_58 {dimension_numbers = #tpu.dot_dimension_numbers<[1], [0], [0], [1], [0, 0, 1, 1], [], []>} : vector<16x32xbf16>, vector<32x384xbf16>, vector<16x384xf32> -> vector<16x384xf32>
      %135 = vector.extract_strided_slice %134 {offsets = [0, 0], sizes = [16, 128], strides = [1, 1]} : vector<16x384xf32> to vector<16x128xf32>
      %136 = vector.extract_strided_slice %134 {offsets = [0, 128], sizes = [16, 128], strides = [1, 1]} : vector<16x384xf32> to vector<16x128xf32>
      %137 = vector.extract_strided_slice %134 {offsets = [0, 256], sizes = [16, 128], strides = [1, 1]} : vector<16x384xf32> to vector<16x128xf32>
      %138 = arith.truncf %135 : vector<16x128xf32> to vector<16x128xbf16>
      %139 = arith.truncf %136 : vector<16x128xf32> to vector<16x128xbf16>
      %cst_59 = arith.constant dense<0.000000e+00> : vector<16x16xf32>
      %140 = tpu.matmul %138, %139, %cst_59 {dimension_numbers = #tpu.dot_dimension_numbers<[1], [1], [0], [0], [0, 0, 1, 0], [], []>} : vector<16x128xbf16>, vector<16x128xbf16>, vector<16x16xf32> -> vector<16x16xf32>
      %141 = arith.addf %140, %19 : vector<16x16xf32>
      %cst_60 = arith.constant dense<0xFF800000> : vector<16xf32>
      %142 = vector.multi_reduction <maximumf>, %141, %cst_60 [1] : vector<16x16xf32> to vector<16xf32>
      %143 = vector.shape_cast %142 : vector<16xf32> to vector<16x1xf32>
      %144 = vector.broadcast %143 : vector<16x1xf32> to vector<16x16xf32>
      %145 = arith.subf %141, %144 : vector<16x16xf32>
      %146 = math.exp %145 : vector<16x16xf32>
      %cst_61 = arith.constant dense<0.000000e+00> : vector<16xf32>
      %147 = vector.multi_reduction <add>, %146, %cst_61 [1] : vector<16x16xf32> to vector<16xf32>
      %148 = vector.shape_cast %147 : vector<16xf32> to vector<16x1xf32>
      %149 = arith.truncf %146 : vector<16x16xf32> to vector<16x16xbf16>
      %150 = arith.truncf %137 : vector<16x128xf32> to vector<16x128xbf16>
      %cst_62 = arith.constant dense<0.000000e+00> : vector<16x128xf32>
      %151 = tpu.matmul %149, %150, %cst_62 {dimension_numbers = #tpu.dot_dimension_numbers<[1], [0], [0], [1], [0, 0, 1, 1], [], []>} : vector<16x16xbf16>, vector<16x128xbf16>, vector<16x128xf32> -> vector<16x128xf32>
      %152 = tpu.reciprocal %148 {approx = true} : vector<16x1xf32> -> vector<16x1xf32>
      %153 = vector.broadcast %152 : vector<16x1xf32> to vector<16x128xf32>
      %154 = arith.mulf %151, %153 : vector<16x128xf32>
      %155 = arith.truncf %154 : vector<16x128xf32> to vector<16x128xbf16>
      %156 = arith.index_cast %c1_i32 : i32 to index
      %c0_63 = arith.constant 0 : index
      %c0_64 = arith.constant 0 : index
      %157 = vector.load %arg5[%156, %c0_63, %c0_64] : memref<2x128x32xbf16, #tpu.memory_space<vmem>>, vector<1x128x32xbf16>
      %158 = vector.shape_cast %157 : vector<1x128x32xbf16> to vector<128x32xbf16>
      %cst_65 = arith.constant dense<0.000000e+00> : vector<16x32xf32>
      %159 = tpu.matmul %155, %158, %cst_65 {dimension_numbers = #tpu.dot_dimension_numbers<[1], [0], [0], [1], [0, 0, 1, 1], [], []>} : vector<16x128xbf16>, vector<128x32xbf16>, vector<16x32xf32> -> vector<16x32xf32>
      %160 = arith.addf %159, %129 : vector<16x32xf32>
      %161 = arith.index_cast %c1_i32 : i32 to index
      %c0_66 = arith.constant 0 : index
      %c0_67 = arith.constant 0 : index
      %162 = vector.load %arg10[%161, %c0_66, %c0_67] : memref<2x1x32xf32, #tpu.memory_space<vmem>>, vector<1x1x32xf32>
      %163 = vector.shape_cast %162 : vector<1x1x32xf32> to vector<1x32xf32>
      %164 = arith.index_cast %c1_i32 : i32 to index
      %c0_68 = arith.constant 0 : index
      %c0_69 = arith.constant 0 : index
      %165 = vector.load %arg11[%164, %c0_68, %c0_69] : memref<2x1x32xf32, #tpu.memory_space<vmem>>, vector<1x1x32xf32>
      %166 = vector.shape_cast %165 : vector<1x1x32xf32> to vector<1x32xf32>
      %cst_70 = arith.constant dense<0.000000e+00> : vector<16xf32>
      %167 = vector.multi_reduction <add>, %160, %cst_70 [1] : vector<16x32xf32> to vector<16xf32>
      %168 = vector.shape_cast %167 : vector<16xf32> to vector<16x1xf32>
      %cst_71 = arith.constant 3.200000e+01 : f32
      %169 = vector.broadcast %cst_71 : f32 to vector<16x1xf32>
      %170 = arith.divf %168, %169 : vector<16x1xf32>
      %171 = arith.mulf %160, %160 : vector<16x32xf32>
      %cst_72 = arith.constant dense<0.000000e+00> : vector<16xf32>
      %172 = vector.multi_reduction <add>, %171, %cst_72 [1] : vector<16x32xf32> to vector<16xf32>
      %173 = vector.shape_cast %172 : vector<16xf32> to vector<16x1xf32>
      %cst_73 = arith.constant 3.200000e+01 : f32
      %174 = vector.broadcast %cst_73 : f32 to vector<16x1xf32>
      %175 = arith.divf %173, %174 : vector<16x1xf32>
      %176 = arith.mulf %170, %170 : vector<16x1xf32>
      %177 = arith.subf %175, %176 : vector<16x1xf32>
      %178 = vector.broadcast %170 : vector<16x1xf32> to vector<16x32xf32>
      %179 = arith.subf %160, %178 : vector<16x32xf32>
      %cst_74 = arith.constant 9.99999974E-6 : f32
      %180 = vector.broadcast %cst_74 : f32 to vector<16x1xf32>
      %181 = arith.addf %177, %180 : vector<16x1xf32>
      %182 = math.rsqrt %181 : vector<16x1xf32>
      %183 = vector.broadcast %182 : vector<16x1xf32> to vector<16x32xf32>
      %184 = arith.mulf %179, %183 : vector<16x32xf32>
      %185 = vector.broadcast %163 : vector<1x32xf32> to vector<16x32xf32>
      %186 = arith.mulf %184, %185 : vector<16x32xf32>
      %187 = vector.broadcast %166 : vector<1x32xf32> to vector<16x32xf32>
      %188 = arith.addf %186, %187 : vector<16x32xf32>
      %189 = arith.truncf %188 : vector<16x32xf32> to vector<16x32xbf16>
      %190 = arith.index_cast %c1_i32 : i32 to index
      %c0_75 = arith.constant 0 : index
      %c0_76 = arith.constant 0 : index
      %191 = vector.load %arg6[%190, %c0_75, %c0_76] : memref<2x32x64xbf16, #tpu.memory_space<vmem>>, vector<1x32x64xbf16>
      %192 = vector.shape_cast %191 : vector<1x32x64xbf16> to vector<32x64xbf16>
      %cst_77 = arith.constant dense<0.000000e+00> : vector<16x64xf32>
      %193 = tpu.matmul %189, %192, %cst_77 {dimension_numbers = #tpu.dot_dimension_numbers<[1], [0], [0], [1], [0, 0, 1, 1], [], []>} : vector<16x32xbf16>, vector<32x64xbf16>, vector<16x64xf32> -> vector<16x64xf32>
      %194 = arith.index_cast %c1_i32 : i32 to index
      %c0_78 = arith.constant 0 : index
      %c0_79 = arith.constant 0 : index
      %195 = vector.load %arg7[%194, %c0_78, %c0_79] : memref<2x1x64xf32, #tpu.memory_space<vmem>>, vector<1x1x64xf32>
      %196 = vector.shape_cast %195 : vector<1x1x64xf32> to vector<1x64xf32>
      %197 = vector.broadcast %196 : vector<1x64xf32> to vector<16x64xf32>
      %198 = arith.addf %193, %197 : vector<16x64xf32>
      %cst_80 = arith.constant 0.000000e+00 : f32
      %199 = vector.broadcast %cst_80 : f32 to vector<16x64xf32>
      %200 = arith.maximumf %198, %199 : vector<16x64xf32>
      %201 = arith.truncf %200 : vector<16x64xf32> to vector<16x64xbf16>
      %202 = arith.index_cast %c1_i32 : i32 to index
      %c0_81 = arith.constant 0 : index
      %c0_82 = arith.constant 0 : index
      %203 = vector.load %arg8[%202, %c0_81, %c0_82] : memref<2x64x32xbf16, #tpu.memory_space<vmem>>, vector<1x64x32xbf16>
      %204 = vector.shape_cast %203 : vector<1x64x32xbf16> to vector<64x32xbf16>
      %cst_83 = arith.constant dense<0.000000e+00> : vector<16x32xf32>
      %205 = tpu.matmul %201, %204, %cst_83 {dimension_numbers = #tpu.dot_dimension_numbers<[1], [0], [0], [1], [0, 0, 1, 1], [], []>} : vector<16x64xbf16>, vector<64x32xbf16>, vector<16x32xf32> -> vector<16x32xf32>
      %206 = arith.index_cast %c1_i32 : i32 to index
      %c0_84 = arith.constant 0 : index
      %c0_85 = arith.constant 0 : index
      %207 = vector.load %arg9[%206, %c0_84, %c0_85] : memref<2x1x32xf32, #tpu.memory_space<vmem>>, vector<1x1x32xf32>
      %208 = vector.shape_cast %207 : vector<1x1x32xf32> to vector<1x32xf32>
      %209 = vector.broadcast %208 : vector<1x32xf32> to vector<16x32xf32>
      %210 = arith.addf %205, %209 : vector<16x32xf32>
      %211 = arith.addf %210, %188 : vector<16x32xf32>
      %212 = arith.index_cast %c1_i32 : i32 to index
      %c0_86 = arith.constant 0 : index
      %c0_87 = arith.constant 0 : index
      %213 = vector.load %arg12[%212, %c0_86, %c0_87] : memref<2x1x32xf32, #tpu.memory_space<vmem>>, vector<1x1x32xf32>
      %214 = vector.shape_cast %213 : vector<1x1x32xf32> to vector<1x32xf32>
      %215 = arith.index_cast %c1_i32 : i32 to index
      %c0_88 = arith.constant 0 : index
      %c0_89 = arith.constant 0 : index
      %216 = vector.load %arg13[%215, %c0_88, %c0_89] : memref<2x1x32xf32, #tpu.memory_space<vmem>>, vector<1x1x32xf32>
      %217 = vector.shape_cast %216 : vector<1x1x32xf32> to vector<1x32xf32>
      %cst_90 = arith.constant dense<0.000000e+00> : vector<16xf32>
      %218 = vector.multi_reduction <add>, %211, %cst_90 [1] : vector<16x32xf32> to vector<16xf32>
      %219 = vector.shape_cast %218 : vector<16xf32> to vector<16x1xf32>
      %cst_91 = arith.constant 3.200000e+01 : f32
      %220 = vector.broadcast %cst_91 : f32 to vector<16x1xf32>
      %221 = arith.divf %219, %220 : vector<16x1xf32>
      %222 = arith.mulf %211, %211 : vector<16x32xf32>
      %cst_92 = arith.constant dense<0.000000e+00> : vector<16xf32>
      %223 = vector.multi_reduction <add>, %222, %cst_92 [1] : vector<16x32xf32> to vector<16xf32>
      %224 = vector.shape_cast %223 : vector<16xf32> to vector<16x1xf32>
      %cst_93 = arith.constant 3.200000e+01 : f32
      %225 = vector.broadcast %cst_93 : f32 to vector<16x1xf32>
      %226 = arith.divf %224, %225 : vector<16x1xf32>
      %227 = arith.mulf %221, %221 : vector<16x1xf32>
      %228 = arith.subf %226, %227 : vector<16x1xf32>
      %229 = vector.broadcast %221 : vector<16x1xf32> to vector<16x32xf32>
      %230 = arith.subf %211, %229 : vector<16x32xf32>
      %cst_94 = arith.constant 9.99999974E-6 : f32
      %231 = vector.broadcast %cst_94 : f32 to vector<16x1xf32>
      %232 = arith.addf %228, %231 : vector<16x1xf32>
      %233 = math.rsqrt %232 : vector<16x1xf32>
      %234 = vector.broadcast %233 : vector<16x1xf32> to vector<16x32xf32>
      %235 = arith.mulf %230, %234 : vector<16x32xf32>
      %236 = vector.broadcast %214 : vector<1x32xf32> to vector<16x32xf32>
      %237 = arith.mulf %235, %236 : vector<16x32xf32>
      %238 = vector.broadcast %217 : vector<1x32xf32> to vector<16x32xf32>
      %239 = arith.addf %237, %238 : vector<16x32xf32>
      %c2_i32 = arith.constant 2 : i32
      %c0_95 = arith.constant 0 : index
      %c0_96 = arith.constant 0 : index
      %240 = vector.load %arg17[%c0_95, %c0_96] : memref<16x32xf32, #tpu.memory_space<vmem>>, vector<16x32xf32>
      tpu.vector_store %arg17[%c0_95, %c0_96], %239 {strides = array<i32>} : memref<16x32xf32, #tpu.memory_space<vmem>>, vector<16x32xf32>,
    } else {
    }
    %c0 = arith.constant 0 : index
    %c0_1 = arith.constant 0 : index
    %3 = vector.load %arg17[%c0, %c0_1] : memref<16x32xf32, #tpu.memory_space<vmem>>, vector<16x32xf32>
    %4 = arith.truncf %3 : vector<16x32xf32> to vector<16x32xbf16>
    %c0_2 = arith.constant 0 : index
    %c0_3 = arith.constant 0 : index
    %5 = vector.load %arg14[%c0_2, %c0_3] : memref<32x128xbf16, #tpu.memory_space<vmem>>, vector<32x128xbf16>
    %cst = arith.constant dense<0.000000e+00> : vector<16x128xf32>
    %6 = tpu.matmul %4, %5, %cst {dimension_numbers = #tpu.dot_dimension_numbers<[1], [0], [0], [1], [0, 0, 1, 1], [], []>} : vector<16x32xbf16>, vector<32x128xbf16>, vector<16x128xf32> -> vector<16x128xf32>
    %c0_4 = arith.constant 0 : index
    %c0_5 = arith.constant 0 : index
    %7 = vector.load %arg15[%c0_4, %c0_5] : memref<1x128xf32, #tpu.memory_space<vmem>>, vector<1x128xf32>
    %8 = vector.broadcast %7 : vector<1x128xf32> to vector<16x128xf32>
    %9 = arith.addf %6, %8 : vector<16x128xf32>
    %c0_6 = arith.constant 0 : index
    %c0_7 = arith.constant 0 : index
    %10 = vector.load %arg16[%c0_6, %c0_7] : memref<16x128xf32, #tpu.memory_space<vmem>>, vector<16x128xf32>
    tpu.vector_store %arg16[%c0_6, %c0_7], %9 {strides = array<i32>} : memref<16x128xf32, #tpu.memory_space<vmem>>, vector<16x128xf32>,
    return
  }
  func.func @transform_0(%arg0: i32) -> (i32, i32) {
    %c0_i32 = arith.constant 0 : i32
    %c0_i32_0 = arith.constant 0 : i32
    %c0_i32_1 = arith.constant 0 : i32
    return %c0_i32, %c0_i32_0 : i32, i32
  }
  func.func @transform_1(%arg0: i32) -> (i32, i32) {
    %c0_i32 = arith.constant 0 : i32
    %c0_i32_0 = arith.constant 0 : i32
    %c0_i32_1 = arith.constant 0 : i32
    return %c0_i32, %c0_i32_0 : i32, i32
  }
  func.func @transform_2(%arg0: i32) -> (i32, i32) {
    %c0_i32 = arith.constant 0 : i32
    %c0_i32_0 = arith.constant 0 : i32
    %c0_i32_1 = arith.constant 0 : i32
    return %c0_i32, %c0_i32_0 : i32, i32
  }
  func.func @transform_3(%arg0: i32) -> (i32, i32, i32) {
    %c0_i32 = arith.constant 0 : i32
    %c0_i32_0 = arith.constant 0 : i32
    %c0_i32_1 = arith.constant 0 : i32
    %c0_i32_2 = arith.constant 0 : i32
    return %c0_i32, %c0_i32_0, %c0_i32_1 : i32, i32, i32
  }
  func.func @transform_4(%arg0: i32) -> (i32, i32, i32) {
    %c0_i32 = arith.constant 0 : i32
    %c0_i32_0 = arith.constant 0 : i32
    %c0_i32_1 = arith.constant 0 : i32
    %c0_i32_2 = arith.constant 0 : i32
    return %c0_i32, %c0_i32_0, %c0_i32_1 : i32, i32, i32
  }
  func.func @transform_5(%arg0: i32) -> (i32, i32, i32) {
    %c0_i32 = arith.constant 0 : i32
    %c0_i32_0 = arith.constant 0 : i32
    %c0_i32_1 = arith.constant 0 : i32
    %c0_i32_2 = arith.constant 0 : i32
    return %c0_i32, %c0_i32_0, %c0_i32_1 : i32, i32, i32
  }
  func.func @transform_6(%arg0: i32) -> (i32, i32, i32) {
    %c0_i32 = arith.constant 0 : i32
    %c0_i32_0 = arith.constant 0 : i32
    %c0_i32_1 = arith.constant 0 : i32
    %c0_i32_2 = arith.constant 0 : i32
    return %c0_i32, %c0_i32_0, %c0_i32_1 : i32, i32, i32
  }
  func.func @transform_7(%arg0: i32) -> (i32, i32, i32) {
    %c0_i32 = arith.constant 0 : i32
    %c0_i32_0 = arith.constant 0 : i32
    %c0_i32_1 = arith.constant 0 : i32
    %c0_i32_2 = arith.constant 0 : i32
    return %c0_i32, %c0_i32_0, %c0_i32_1 : i32, i32, i32
  }
  func.func @transform_8(%arg0: i32) -> (i32, i32, i32) {
    %c0_i32 = arith.constant 0 : i32
    %c0_i32_0 = arith.constant 0 : i32
    %c0_i32_1 = arith.constant 0 : i32
    %c0_i32_2 = arith.constant 0 : i32
    return %c0_i32, %c0_i32_0, %c0_i32_1 : i32, i32, i32
  }
  func.func @transform_9(%arg0: i32) -> (i32, i32, i32) {
    %c0_i32 = arith.constant 0 : i32
    %c0_i32_0 = arith.constant 0 : i32
    %c0_i32_1 = arith.constant 0 : i32
    %c0_i32_2 = arith.constant 0 : i32
    return %c0_i32, %c0_i32_0, %c0_i32_1 : i32, i32, i32
  }
  func.func @transform_10(%arg0: i32) -> (i32, i32, i32) {
    %c0_i32 = arith.constant 0 : i32
    %c0_i32_0 = arith.constant 0 : i32
    %c0_i32_1 = arith.constant 0 : i32
    %c0_i32_2 = arith.constant 0 : i32
    return %c0_i32, %c0_i32_0, %c0_i32_1 : i32, i32, i32
  }
  func.func @transform_11(%arg0: i32) -> (i32, i32, i32) {
    %c0_i32 = arith.constant 0 : i32
    %c0_i32_0 = arith.constant 0 : i32
    %c0_i32_1 = arith.constant 0 : i32
    %c0_i32_2 = arith.constant 0 : i32
    return %c0_i32, %c0_i32_0, %c0_i32_1 : i32, i32, i32
  }
  func.func @transform_12(%arg0: i32) -> (i32, i32, i32) {
    %c0_i32 = arith.constant 0 : i32
    %c0_i32_0 = arith.constant 0 : i32
    %c0_i32_1 = arith.constant 0 : i32
    %c0_i32_2 = arith.constant 0 : i32
    return %c0_i32, %c0_i32_0, %c0_i32_1 : i32, i32, i32
  }
  func.func @transform_13(%arg0: i32) -> (i32, i32) {
    %c0_i32 = arith.constant 0 : i32
    %c0_i32_0 = arith.constant 0 : i32
    return %c0_i32, %arg0 : i32, i32
  }
  func.func @transform_14(%arg0: i32) -> (i32, i32) {
    %c0_i32 = arith.constant 0 : i32
    %c0_i32_0 = arith.constant 0 : i32
    return %c0_i32, %arg0 : i32, i32
  }
  func.func @transform_15(%arg0: i32) -> (i32, i32) {
    %c0_i32 = arith.constant 0 : i32
    %c0_i32_0 = arith.constant 0 : i32
    return %c0_i32, %arg0 : i32, i32
  }
}

</mosaic_0001>

<bundles_post_ra>
// kernel: tiny_transformer_decoder.1
= control target key start
LH: loop header
LB: loop body
LE: loop exit
PB: predicated region body
PF: predicated region fallthrough
CT: control target
= control target key end

     0   :  { %vm118_vm0 = vcmask 261120   ;;  %v1339_v17 = vmov 0   ;;  %v1340_v32 = vmov -1e+09   ;;  %vm180_vm2 = vcmask 130048   ;;  %s1749_s3 = inlined_call_operand.vmem [shape: bf16[2,32,384], index: 3, kind: input, shape index: {}]   ;;  %s1750_s0 = inlined_call_operand.vmem [shape: f32[16,32], index: 0, kind: input, shape index: {}]   ;;  %s1751_s2 = inlined_call_operand.vmem [shape: f32[1,16], index: 2, kind: input, shape index: {}]   ;;  %s1752_s1 = inlined_call_operand.vmem [shape: f32[16,1], index: 1, kind: input, shape index: {}]   ;;  %s1753_s4 = inlined_call_operand.vmem [shape: bf16[2,128,32], index: 4, kind: input, shape index: {}]   ;;  %s1754_s9 = inlined_call_operand.vmem [shape: f32[2,1,32], index: 9, kind: input, shape index: {}]   ;;  %s1755_s10 = inlined_call_operand.vmem [shape: f32[2,1,32], index: 10, kind: input, shape index: {}]   ;;  %s1756_s6 = inlined_call_operand.vmem [shape: f32[2,1,64], index: 6, kind: input, shape index: {}]   ;;  %s1757_s5 = inlined_call_operand.vmem [shape: bf16[2,32,64], index: 5, kind: input, shape index: {}]   ;;  %s1758_s8 = inlined_call_operand.vmem [shape: f32[2,1,32], index: 8, kind: input, shape index: {}]   ;;  %s1759_s7 = inlined_call_operand.vmem [shape: bf16[2,64,32], index: 7, kind: input, shape index: {}]   ;;  %s1760_s11 = inlined_call_operand.vmem [shape: f32[2,1,32], index: 11, kind: input, shape index: {}]   ;;  %s1761_s12 = inlined_call_operand.vmem [shape: f32[2,1,32], index: 12, kind: input, shape index: {}]   ;;  %s1762_s14 = inlined_call_operand.vmem [shape: f32[1,128], index: 14, kind: input, shape index: {}]   ;;  %s1763_s13 = inlined_call_operand.vmem [shape: bf16[32,128], index: 13, kind: input, shape index: {}]   ;;  %s1764_s15 = inlined_call_operand.vmem [shape: f32[16,128], index: 15, kind: output, shape index: {}]  }
   0x1   :  { %v1036_v0 = vld [vmem:[%s1749_s3 + $0x18] sm:$0xf]  ;;  %v1249_v1 = vld [vmem:[%s1749_s3 + $0x20] sm:$0xf0]  ;;  %v1248_v2 = vld [vmem:[%s1749_s3 + $0x1c] sm:$0xf]  ;;  %1290 = vset.pattern.permute.xlu0 %v1339_v17 }
   0x2   :  { %v1037_v3 = vor.u32 %v1249_v1, %v1036_v0  ;;  %v1038_v4 = vld [vmem:[%s1749_s3 + $0x24] sm:$0xf0]  ;;  %v1024_v5 = vld [vmem:[%s1749_s3] sm:$0xf]  ;;  %v1246_v6 = vld [vmem:[%s1749_s3 + $0x8] sm:$0xf0] }
   0x3   :  { %v1041_v7 = vor.u32 %v1248_v2, %v1038_v4  ;;  %v1245_v8 = vld [vmem:[%s1749_s3 + $0x4] sm:$0xf]  ;;  %v1026_v9 = vld [vmem:[%s1749_s3 + $0xc] sm:$0xf0]  ;;  %v1025_v10 = vor.u32 %v1246_v6, %v1024_v5  ;;  %v1454_v12 = vld [vmem:[%s1750_s0 + $0x8] sm:$0xff]  ;;  %vm445_vm11 = vcmask 523264  }
   0x4   :  { %128 = vmatpush.bf16.msra.mxu0 %v1037_v3  ;;  %v1449_v11 = vld [vmem:[%s1750_s0] sm:$0xff]  ;;  %v1029_v13 = vor.u32 %v1245_v8, %v1026_v9  ;;  %v1250_v18 = vld [vmem:[%s1749_s3 + $0x28] sm:$0xf0]  ;;  %v1032_v19 = vld [vmem:[%s1749_s3 + $0x8] sm:$0xf] }
   0x5   :  { %142 = vmatpush.bf16.msra.mxu1 %v1041_v7  ;;  %v77_v14 = vpack.c.bf16 %v1454_v12, %v1449_v11  ;;  %v57_v15 = vld [vmem:[%s1752_s1] sm:$0xff]  ;;  %v1247_v20 = vld [vmem:[%s1749_s3 + $0x10] sm:$0xf0]  ;;  %v58_v23 = vld [vmem:[%s1752_s1 + $0x8] sm:$0xff] }
   0x6   :  { %v1044_v16 = vld [vmem:[%s1749_s3 + $0x20] sm:$0xf]  ;;  %62 = vperm.xlu0 %1290, %v57_v15   ;;  %v1033_v22 = vor.u32 %v1247_v20, %v1032_v19  ;;  %v1258_v56 = vld [vmem:[%s1753_s4 + $0x38] sm:$0xff]  ;;  %v1257_v57 = vld [vmem:[%s1753_s4 + $0x30] sm:$0xff]  ;;  %v1341_v20 = vmov 32.0  }
   0x7   :  { %v1045_v21 = vor.u32 %v1250_v18, %v1044_v16  ;;  %v1291_v30 = vld [vmem:[%s1751_s2] ss:$0 sm:$0xff]  ;;  %v1256_v58 = vld [vmem:[%s1753_s4 + $0x28] sm:$0xff]  ;;  %v1254_v60 = vld [vmem:[%s1753_s4 + $0x18] sm:$0xff] }
   0x8   :  { %129 = vmatpush.bf16.msra.mxu0 %v1025_v10  ;;  %v1255_v59 = vld [vmem:[%s1753_s4 + $0x20] sm:$0xff]  ;;  %v1253_v61 = vld [vmem:[%s1753_s4 + $0x10] sm:$0xff]  ;;  %v1252_v62 = vld [vmem:[%s1753_s4 + $0x8] sm:$0xff] }
   0x9   :  { %143 = vmatpush.bf16.msra.mxu1 %v1029_v13  ;;  %156 = vmatpush.bf16.msra.mxu2 %v1045_v21  ;;  %v1251_v63 = vld [vmem:[%s1753_s4] sm:$0xff] }
   0xb   :  { %1046 = vmatmul.msk.bf16.vlgmr.msra.gmra.mxu0 %vm118_vm0, %v77_v14 }
   0xc   :  { %1047 = vmatmul.msk.bf16.vlgmr.msra.gmra.mxu1 %vm118_vm0, %v77_v14 }
   0xd   :  { %157 = vmatpush.bf16.msra.mxu2 %v1033_v22  ;;  %287 = vmatpush.bf16.msrb.mxu1 %v1258_v56 }
   0xe   :  { %67 = vperm.xlu0 %1290, %v58_v23  }
  0x10   :  { %1048 = vmatmul.msk.bf16.vlgmr.msra.gmra.mxu2 %vm118_vm0, %v77_v14 }
  0x11   :  { %288 = vmatpush.bf16.msrb.mxu1 %v1257_v57 }
  0x15   :  { %289 = vmatpush.bf16.msrb.mxu1 %v1256_v58  ;;  %v1292_v58 = vld [vmem:[%s1754_s9] ss:$0 sm:$0xff] }
  0x19   :  { %290 = vmatpush.bf16.msrb.mxu1 %v1255_v59 }
  0x1d   :  { %291 = vmatpush.bf16.msrb.mxu1 %v1254_v60 }
  0x21   :  { %292 = vmatpush.bf16.msrb.mxu1 %v1253_v61 }
  0x25   :  { %293 = vmatpush.bf16.msrb.mxu1 %v1252_v62 }
  0x29   :  { %294 = vmatpush.bf16.msrb.mxu1 %v1251_v63 }
  0x78   :  { %v63_v31 = vpop.permute.xlu0 %62 }
  0x79   :  { %vm73_vm1 = vcmp.eq.f32.partialorder %v63_v31, %v1291_v30 }
  0x7a   :  { %v1482_v33 = vsel %vm73_vm1, 0.0, %v1340_v32 }
  0x80   :  { %v68_v36 = vpop.permute.xlu0 %67 }
  0x81   :  { %vm74_vm3 = vcmp.eq.f32.partialorder %v68_v36, %v1291_v30  ;;  %v1259_v36 = vld [vmem:[%s1757_s5] sm:$0xff] }
  0x82   :  { %v1486_v38 = vsel %vm74_vm3, 0.0, %v1340_v32 }
  0x88   :  { %v131_v25 = vpop.f32.mrf.mxu0 }
  0x89   :  { %v145_v24 = vpop.f32.mrf.mxu1 }
  0x90   :  { %v133_v28 = vpop.f32.mrf.mxu0 }
  0x91   :  { %v147_v26 = vpop.f32.mrf.mxu1  ;;  %v164_v29 = vpack.c.bf16 %v133_v28, %v131_v25 }
  0x92   :  { %v165_v27 = vpack.c.bf16 %v147_v26, %v145_v24 }
  0x93   :  { %v159_v42 = vpop.f32.mrf.mxu2 }
  0x94   :  { %173 = vmatpush.bf16.xpose.msra.mxu3 %v165_v27 }
  0x9b   :  { %174 = vmatmul.bf16.vlgmr.msra.gmra.mxu3 %v164_v29  ;;  %v161_v43 = vpop.f32.mrf.mxu2 }
  0x9c   :  { %v200_v44 = vpack.c.bf16 %v161_v43, %v159_v42 }
  0x9e   :  { %211 = vmatpush.bf16.msrb.mxu0 %v200_v44 }
 0x11e   :  { %v175_v34 = vpop.f32.mrf.mxu3 }
 0x11f   :  { %v176_v35 = vadd.f32 %v175_v34, %v1482_v33 }
 0x121   :  { %v181_v37 = vsel %vm180_vm2, %v176_v35, -inf }
 0x122   :  { %182 = vmax.xlane.f32.xlu1 %v181_v37 }
 0x126   :  { %v177_v39 = vpop.f32.mrf.mxu3 }
 0x127   :  { %v178_v40 = vadd.f32 %v177_v39, %v1486_v38 }
 0x129   :  { %v184_v41 = vsel %vm180_vm2, %v178_v40, -inf }
 0x12a   :  { %185 = vmax.xlane.f32.xlu1 %v184_v41 }
 0x195   :  { %v183_v45 = vpop.xlane.xlu1 %182 }
 0x196   :  { %v187_v46 = vsub.f32 %v176_v35, %v183_v45  ;;  %v1260_v35 = vld [vmem:[%s1757_s5 + $0x8] sm:$0xff] }
 0x197   :  { %398 = vmatpush.bf16.msrb.mxu2 %v1260_v35  ;;  %v1269_v35 = vld [vmem:[%s1749_s3 + $0x50] sm:$0xf0] }
 0x198   :  { %v189_v47 = vmul.f32 1.442695, %v187_v46 }
 0x19a   :  { %1305 = vpow2.f32 %v189_v47 }
 0x19b   :  { %399 = vmatpush.bf16.msrb.mxu2 %v1259_v36  ;;  %v1268_v36 = vld [vmem:[%s1749_s3 + $0x4c] sm:$0xf] }
 0x19d   :  { %v186_v48 = vpop.xlane.xlu1 %185 }
 0x19e   :  { %v188_v49 = vsub.f32 %v178_v40, %v186_v48 }
 0x1a0   :  { %v1306_v50 = vpop.eup %1305  ;;  %v191_v51 = vmul.f32 1.442695, %v188_v49 }
 0x1a1   :  { %v193_v52 = vsel %vm180_vm2, %v1306_v50, 0.0 }
 0x1a2   :  { %1307 = vpow2.f32 %v191_v51  ;;  %194 = vadd.xlane.f32.xlu2 %v193_v52 }
 0x1a8   :  { %v1308_v53 = vpop.eup %1307 }
 0x1a9   :  { %v196_v54 = vsel %vm180_vm2, %v1308_v53, 0.0  ;;  %v199_v55 = vpack.c.bf16 %v1308_v53, %v1306_v50 }
 0x1aa   :  { %197 = vadd.xlane.f32.xlu2 %v196_v54 }
 0x1ab   :  { %1049 = vmatmul.msk.bf16.vlgmr.msrb.gmra.mxu0 %vm180_vm2, %v199_v55 }
 0x215   :  { %v195_v0 = vpop.xlane.xlu2 %194 }
 0x216   :  { %1309 = vrcp.f32 %v195_v0  ;;  %v1293_v0 = vld [vmem:[%s1755_s10] ss:$0 sm:$0xff] }
 0x21c   :  { %v1310_v3 = vpop.eup %1309 }
 0x21d   :  { %v198_v1 = vpop.xlane.xlu2 %197 }
 0x21e   :  { %1311 = vrcp.f32 %v198_v1 }
 0x21f   :  { %1313 = vrcp.f32 %v1341_v20 }
 0x224   :  { %v1312_v4 = vpop.eup %1311 }
 0x225   :  { %v1314_v21 = vpop.eup %1313 }
 0x226   :  { %v310_v22 = vmul.f32 32.0, %v1314_v21  ;;  %vm314_vm4 = vweird.f32 %v1314_v21 }
 0x228   :  { %v213_v2 = vpop.f32.mrf.mxu0  ;;  %v311_v23 = vsub.f32 1.0, %v310_v22 }
 0x229   :  { %v220_v6 = vmul.f32 %v1310_v3, %v213_v2 }
 0x22a   :  { %v312_v24 = vmul.f32 %v1314_v21, %v311_v23 }
 0x22c   :  { %v313_v25 = vadd.f32 %v1314_v21, %v312_v24 }
 0x230   :  { %v215_v5 = vpop.f32.mrf.mxu0 }
 0x231   :  { %v221_v7 = vmul.f32 %v1312_v4, %v215_v5  ;;  %v1264_v5 = vld [vmem:[%s1759_s7 + $0x18] sm:$0xff] }
 0x232   :  { %453 = vmatpush.bf16.msrb.mxu3 %v1264_v5 }
 0x233   :  { %v222_v8 = vpack.c.bf16 %v221_v7, %v220_v6  ;;  %v1263_v6 = vld [vmem:[%s1759_s7 + $0x10] sm:$0xff]  ;;  %v1262_v7 = vld [vmem:[%s1759_s7 + $0x8] sm:$0xff] }
 0x235   :  { %295 = vmatmul.bf16.vlgmr.msrb.gmra.mxu1 %v222_v8  ;;  %v1261_v8 = vld [vmem:[%s1759_s7] sm:$0xff] }
 0x236   :  { %454 = vmatpush.bf16.msrb.mxu3 %v1263_v6 }
 0x23a   :  { %455 = vmatpush.bf16.msrb.mxu3 %v1262_v7 }
 0x23e   :  { %456 = vmatpush.bf16.msrb.mxu3 %v1261_v8 }
 0x2b2   :  { %v296_v9 = vpop.f32.mrf.mxu1 }
 0x2b3   :  { %v1518_v10 = vadd.f32 %v296_v9, %v1449_v11 }
 0x2b5   :  { %v303_v13 = vsel %vm118_vm0, %v1518_v10, 0.0  ;;  %v318_v14 = vmul.f32 %v1518_v10, %v1518_v10 }
 0x2b6   :  { %304 = vadd.xlane.f32.xlu0 %v303_v13 }
 0x2b7   :  { %v320_v15 = vsel %vm118_vm0, %v318_v14, 0.0 }
 0x2b8   :  { %321 = vadd.xlane.f32.xlu2 %v320_v15 }
 0x2ba   :  { %v298_v16 = vpop.f32.mrf.mxu1 }
 0x2bb   :  { %v1526_v17 = vadd.f32 %v298_v16, %v1454_v12  ;;  %v1533_v12 = vsel %vm314_vm4, %v1314_v21, %v313_v25 }
 0x2bd   :  { %v306_v18 = vsel %vm118_vm0, %v1526_v17, 0.0  ;;  %v319_v11 = vmul.f32 %v1526_v17, %v1526_v17 }
 0x2be   :  { %307 = vadd.xlane.f32.xlu1 %v306_v18 }
 0x2bf   :  { %v323_v19 = vsel %vm118_vm0, %v319_v11, 0.0  ;;  %v1296_v11 = vld [vmem:[%s1758_s8] ss:$0 sm:$0xff] }
 0x2c6   :  { %324 = vadd.xlane.f32.xlu1 %v323_v19 }
 0x329   :  { %v305_v26 = vpop.xlane.xlu0 %304 }
 0x32a   :  { %v316_v27 = vmul.f32 %v1533_v12, %v305_v26 }
 0x32b   :  { %v322_v28 = vpop.xlane.xlu2 %321 }
 0x32c   :  { %v328_v29 = vmul.f32 %v316_v27, %v316_v27  ;;  %v326_v30 = vmul.f32 %v322_v28, %v1533_v12  ;;  %v332_v55 = vsub.f32 %v1518_v10, %v316_v27  ;;  %v1295_v10 = vld [vmem:[%s1756_s6] ss:$0 sm:$0xff] }
 0x32e   :  { %v330_v31 = vsub.f32 %v326_v30, %v328_v29 }
 0x330   :  { %v334_v32 = vadd.f32 1e-05, %v330_v31 }
 0x331   :  { %v308_v34 = vpop.xlane.xlu1 %307 }
 0x332   :  { %1315 = vrsqrt.f32 %v334_v32  ;;  %v317_v37 = vmul.f32 %v1533_v12, %v308_v34  ;;  %vm342_vm6 = vweird.f32 %v334_v32  ;;  %v1130_v34 = vld [vmem:[%s1749_s3 + $0x48] sm:$0xf] }
 0x334   :  { %v329_v42 = vmul.f32 %v317_v37, %v317_v37  ;;  %v333_v60 = vsub.f32 %v1526_v17, %v317_v37 }
 0x338   :  { %v1316_v39 = vpop.eup %1315 }
 0x339   :  { %v337_v40 = vmul.f32 %v1316_v39, %v334_v32  ;;  %v325_v41 = vpop.xlane.xlu1 %324  ;;  %vm343_vm5 = vweird.f32 %v1316_v39 }
 0x33a   :  { %v327_v43 = vmul.f32 %v325_v41, %v1533_v12  ;;  %vm344_vm7 = vmor %vm342_vm6, %vm343_vm5  ;;  %v1132_v41 = vld [vmem:[%s1749_s3 + $0x54] sm:$0xf0] }
 0x33b   :  { %v338_v44 = vmul.f32 %v1316_v39, %v337_v40  ;;  %v1131_v40 = vor.u32 %v1269_v35, %v1130_v34 }
 0x33c   :  { %v331_v45 = vsub.f32 %v327_v43, %v329_v42  ;;  %v1138_v42 = vld [vmem:[%s1749_s3 + $0x50] sm:$0xf]  ;;  %v1270_v43 = vld [vmem:[%s1749_s3 + $0x58] sm:$0xf0] }
 0x33d   :  { %v339_v47 = vmul.f32 0.5, %v338_v44  ;;  %576 = vmatpush.bf16.msra.mxu0 %v1131_v40 }
 0x33e   :  { %v335_v46 = vadd.f32 1e-05, %v331_v45 }
 0x33f   :  { %v340_v48 = vsub.f32 1.5, %v339_v47  ;;  %v1139_v47 = vor.u32 %v1270_v43, %v1138_v42 }
 0x340   :  { %1317 = vrsqrt.f32 %v335_v46  ;;  %vm352_vm9 = vweird.f32 %v335_v46 }
 0x341   :  { %v341_v50 = vmul.f32 %v1316_v39, %v340_v48  ;;  %604 = vmatpush.bf16.msra.mxu3 %v1139_v47 }
 0x343   :  { %v345_v53 = vsel %vm344_vm7, %v1316_v39, %v341_v50  ;;  %v1266_v50 = vld [vmem:[%s1749_s3 + $0x38] sm:$0xf0] }
 0x344   :  { %v356_v57 = vmul.f32 %v345_v53, %v332_v55  ;;  %v1120_v53 = vld [vmem:[%s1749_s3 + $0x3c] sm:$0xf0]  ;;  %v1267_v55 = vld [vmem:[%s1749_s3 + $0x40] sm:$0xf0] }
 0x346   :  { %v1318_v49 = vpop.eup %1317  ;;  %v361_v63 = vmul.f32 %v1292_v58, %v356_v57 }
 0x347   :  { %v347_v51 = vmul.f32 %v1318_v49, %v335_v46  ;;  %vm353_vm8 = vweird.f32 %v1318_v49  ;;  %v1135_v46 = vor.u32 %v1268_v36, %v1132_v41 }
 0x348   :  { %vm354_vm10 = vmor %vm352_vm9, %vm353_vm8  ;;  %v366_v2 = vadd.f32 %v1293_v0, %v361_v63 }
 0x349   :  { %v348_v52 = vmul.f32 %v1318_v49, %v347_v51  ;;  %590 = vmatpush.bf16.msra.mxu2 %v1135_v46  ;;  %v1265_v51 = vld [vmem:[%s1749_s3 + $0x34] sm:$0xf] }
 0x34b   :  { %v349_v54 = vmul.f32 0.5, %v348_v52 }
 0x34d   :  { %v350_v56 = vsub.f32 1.5, %v349_v54  ;;  %v1126_v54 = vld [vmem:[%s1749_s3 + $0x38] sm:$0xf] }
 0x34f   :  { %v351_v59 = vmul.f32 %v1318_v49, %v350_v56 }
 0x351   :  { %v355_v61 = vsel %vm354_vm10, %v1318_v49, %v351_v59  ;;  %v1118_v49 = vld [vmem:[%s1749_s3 + $0x30] sm:$0xf]  ;;  %v1127_v59 = vor.u32 %v1267_v55, %v1126_v54  ;;  %v1276_v55 = vld [vmem:[%s1753_s4 + $0x68] sm:$0xff] }
 0x352   :  { %v357_v62 = vmul.f32 %v355_v61, %v333_v60  ;;  %v1119_v52 = vor.u32 %v1266_v50, %v1118_v49  ;;  %v1277_v54 = vld [vmem:[%s1753_s4 + $0x70] sm:$0xff] }
 0x353   :  { %605 = vmatpush.bf16.msra.mxu3 %v1127_v59  ;;  %v1272_v59 = vld [vmem:[%s1753_s4 + $0x48] sm:$0xff] }
 0x354   :  { %v362_v1 = vmul.f32 %v1292_v58, %v357_v62  ;;  %v1123_v58 = vor.u32 %v1265_v51, %v1120_v53  ;;  %577 = vmatpush.bf16.msra.mxu0 %v1119_v52 }
 0x356   :  { %v367_v3 = vadd.f32 %v1293_v0, %v362_v1  ;;  %591 = vmatpush.bf16.msra.mxu2 %v1123_v58  ;;  %v1273_v58 = vld [vmem:[%s1753_s4 + $0x50] sm:$0xff] }
 0x358   :  { %v368_v4 = vpack.c.bf16 %v367_v3, %v366_v2 }
 0x35a   :  { %1090 = vmatmul.msk.bf16.vlgmr.msrb.gmra.mxu2 %vm118_vm0, %v368_v4 }
 0x3dd   :  { %v401_v9 = vpop.f32.mrf.mxu2 }
 0x3de   :  { %v402_v13 = vadd.f32 %v1295_v10, %v401_v9 }
 0x3e0   :  { %v406_v16 = vmax.f32 %v402_v13, 0.0 }
 0x3e5   :  { %v403_v14 = vpop.f32.mrf.mxu2 }
 0x3e6   :  { %v404_v15 = vadd.f32 %v1295_v10, %v403_v14 }
 0x3e8   :  { %v407_v17 = vmax.f32 %v404_v15, 0.0 }
 0x3ea   :  { %v408_v18 = vpack.c.bf16 %v407_v17, %v406_v16  ;;  %v1297_v16 = vld [vmem:[%s1760_s11] ss:$0 sm:$0xff] }
 0x3ec   :  { %1107 = vmatmul.msk.bf16.vlgmr.msrb.gmra.mxu3 %vm445_vm11, %v408_v18 }
 0x46f   :  { %v458_v19 = vpop.f32.mrf.mxu3 }
 0x470   :  { %v459_v20 = vadd.f32 %v1296_v11, %v458_v19 }
 0x472   :  { %v1573_v21 = vadd.f32 %v459_v20, %v366_v2 }
 0x474   :  { %v467_v22 = vsel %vm118_vm0, %v1573_v21, 0.0  ;;  %v475_v25 = vmul.f32 %v1573_v21, %v1573_v21 }
 0x475   :  { %468 = vadd.xlane.f32.xlu2 %v467_v22 }
 0x476   :  { %v477_v28 = vsel %vm118_vm0, %v475_v25, 0.0 }
 0x477   :  { %v460_v23 = vpop.f32.mrf.mxu3 }
 0x478   :  { %v461_v24 = vadd.f32 %v1296_v11, %v460_v23  ;;  %v1298_v23 = vld [vmem:[%s1761_s12] ss:$0 sm:$0xff] }
 0x47a   :  { %v1579_v26 = vadd.f32 %v461_v24, %v367_v3 }
 0x47c   :  { %v470_v27 = vsel %vm118_vm0, %v1579_v26, 0.0  ;;  %v476_v29 = vmul.f32 %v1579_v26, %v1579_v26 }
 0x47d   :  { %471 = vadd.xlane.f32.xlu1 %v470_v27  ;;  %478 = vadd.xlane.f32.xlu2 %v477_v28 }
 0x47e   :  { %v480_v30 = vsel %vm118_vm0, %v476_v29, 0.0 }
 0x485   :  { %481 = vadd.xlane.f32.xlu1 %v480_v30 }
 0x4e8   :  { %v469_v31 = vpop.xlane.xlu2 %468 }
 0x4e9   :  { %v473_v32 = vmul.f32 %v469_v31, %v1533_v12 }
 0x4eb   :  { %v485_v44 = vmul.f32 %v473_v32, %v473_v32  ;;  %v489_v14 = vsub.f32 %v1573_v21, %v473_v32 }
 0x4f0   :  { %v472_v37 = vpop.xlane.xlu1 %471  ;;  %v479_v39 = vpop.xlane.xlu2 %478 }
 0x4f1   :  { %v483_v45 = vmul.f32 %v479_v39, %v1533_v12  ;;  %v474_v56 = vmul.f32 %v472_v37, %v1533_v12 }
 0x4f3   :  { %v487_v48 = vsub.f32 %v483_v45, %v485_v44  ;;  %v486_v61 = vmul.f32 %v474_v56, %v474_v56  ;;  %v490_v11 = vsub.f32 %v1579_v26, %v474_v56  ;;  %v1275_v56 = vld [vmem:[%s1753_s4 + $0x60] sm:$0xff] }
 0x4f5   :  { %v491_v57 = vadd.f32 1e-05, %v487_v48 }
 0x4f7   :  { %1319 = vrsqrt.f32 %v491_v57  ;;  %vm499_vm13 = vweird.f32 %v491_v57 }
 0x4f8   :  { %v482_v60 = vpop.xlane.xlu1 %481 }
 0x4f9   :  { %v484_v62 = vmul.f32 %v482_v60, %v1533_v12  ;;  %v1271_v60 = vld [vmem:[%s1753_s4 + $0x40] sm:$0xff] }
 0x4fb   :  { %v488_v63 = vsub.f32 %v484_v62, %v486_v61 }
 0x4fd   :  { %v1320_v0 = vpop.eup %1319  ;;  %v492_v1 = vadd.f32 1e-05, %v488_v63 }
 0x4fe   :  { %v494_v2 = vmul.f32 %v1320_v0, %v491_v57  ;;  %vm500_vm12 = vweird.f32 %v1320_v0  ;;  %v1274_v57 = vld [vmem:[%s1753_s4 + $0x58] sm:$0xff] }
 0x4ff   :  { %1321 = vrsqrt.f32 %v492_v1  ;;  %vm501_vm14 = vmor %vm499_vm13, %vm500_vm12  ;;  %vm509_vm1 = vweird.f32 %v492_v1 }
 0x500   :  { %v495_v3 = vmul.f32 %v1320_v0, %v494_v2 }
 0x502   :  { %v496_v4 = vmul.f32 0.5, %v495_v3 }
 0x504   :  { %v497_v5 = vsub.f32 1.5, %v496_v4 }
 0x505   :  { %v1322_v6 = vpop.eup %1321 }
 0x506   :  { %v498_v7 = vmul.f32 %v1320_v0, %v497_v5  ;;  %v504_v8 = vmul.f32 %v1322_v6, %v492_v1  ;;  %vm510_vm15 = vweird.f32 %v1322_v6 }
 0x507   :  { %vm511_vm3 = vmor %vm509_vm1, %vm510_vm15 }
 0x508   :  { %v505_v9 = vmul.f32 %v1322_v6, %v504_v8  ;;  %v502_v10 = vsel %vm501_vm14, %v1320_v0, %v498_v7 }
 0x509   :  { %v513_v17 = vmul.f32 %v502_v10, %v489_v14 }
 0x50a   :  { %v506_v13 = vmul.f32 0.5, %v505_v9 }
 0x50b   :  { %v518_v20 = vmul.f32 %v1297_v16, %v513_v17 }
 0x50c   :  { %v507_v15 = vsub.f32 1.5, %v506_v13 }
 0x50d   :  { %v1635_v24 = vadd.f32 %v1298_v23, %v518_v20 }
 0x50e   :  { %v508_v18 = vmul.f32 %v1322_v6, %v507_v15 }
 0x510   :  { %v512_v19 = vsel %vm511_vm3, %v1322_v6, %v508_v18 }
 0x511   :  { %v514_v22 = vmul.f32 %v512_v19, %v490_v11 }
 0x513   :  { %v519_v21 = vmul.f32 %v1297_v16, %v514_v22 }
 0x515   :  { %v1637_v25 = vadd.f32 %v1298_v23, %v519_v21  ;;  %v1280_v23 = vld [vmem:[%s1757_s5 + $0x18] sm:$0xff] }
 0x516   :  { %843 = vmatpush.bf16.msrb.mxu3 %v1280_v23 }
 0x517   :  { %v525_v27 = vpack.c.bf16 %v1637_v25, %v1635_v24 }
 0x519   :  { %1140 = vmatmul.msk.bf16.vlgmr.msra.gmra.mxu0 %vm118_vm0, %v525_v27  ;;  %1141 = vmatmul.msk.bf16.vlgmr.msra.gmra.mxu2 %vm118_vm0, %v525_v27 }
 0x51a   :  { %1142 = vmatmul.msk.bf16.vlgmr.msra.gmra.mxu3 %vm118_vm0, %v525_v27 }
 0x596   :  { %v579_v29 = vpop.f32.mrf.mxu0 }
 0x59c   :  { %v593_v26 = vpop.f32.mrf.mxu2 }
 0x59d   :  { %v607_v28 = vpop.f32.mrf.mxu3 }
 0x59e   :  { %v581_v35 = vpop.f32.mrf.mxu0 }
 0x59f   :  { %v612_v36 = vpack.c.bf16 %v581_v35, %v579_v29 }
 0x5a4   :  { %v595_v30 = vpop.f32.mrf.mxu2 }
 0x5a5   :  { %v613_v31 = vpack.c.bf16 %v595_v30, %v593_v26  ;;  %v609_v32 = vpop.f32.mrf.mxu3 }
 0x5a6   :  { %v647_v34 = vpack.c.bf16 %v609_v32, %v607_v28 }
 0x5a7   :  { %621 = vmatpush.bf16.xpose.msrb.mxu0 %v613_v31 }
 0x5a8   :  { %658 = vmatpush.bf16.msra.mxu1 %v647_v34 }
 0x5ae   :  { %622 = vmatmul.bf16.vlgmr.msrb.gmra.mxu0 %v612_v36 }
 0x62b   :  { %v623_v37 = vpop.f32.mrf.mxu0 }
 0x62c   :  { %v624_v39 = vadd.f32 %v623_v37, %v1482_v33 }
 0x62e   :  { %v628_v40 = vsel %vm180_vm2, %v624_v39, -inf }
 0x62f   :  { %629 = vmax.xlane.f32.xlu2 %v628_v40 }
 0x633   :  { %v625_v41 = vpop.f32.mrf.mxu0 }
 0x634   :  { %v626_v42 = vadd.f32 %v625_v41, %v1486_v38  ;;  %v1278_v38 = vld [vmem:[%s1753_s4 + $0x78] sm:$0xff] }
 0x635   :  { %735 = vmatpush.bf16.msrb.mxu2 %v1278_v38 }
 0x636   :  { %v631_v43 = vsel %vm180_vm2, %v626_v42, -inf }
 0x637   :  { %632 = vmax.xlane.f32.xlu1 %v631_v43 }
 0x639   :  { %736 = vmatpush.bf16.msrb.mxu2 %v1277_v54 }
 0x63d   :  { %737 = vmatpush.bf16.msrb.mxu2 %v1276_v55 }
 0x641   :  { %738 = vmatpush.bf16.msrb.mxu2 %v1275_v56 }
 0x645   :  { %739 = vmatpush.bf16.msrb.mxu2 %v1274_v57 }
 0x649   :  { %740 = vmatpush.bf16.msrb.mxu2 %v1273_v58  ;;  %v1284_v58 = vld [vmem:[%s1759_s7 + $0x38] sm:$0xff] }
 0x64a   :  { %899 = vmatpush.bf16.msra.mxu0 %v1284_v58 }
 0x64d   :  { %741 = vmatpush.bf16.msrb.mxu2 %v1272_v59  ;;  %v1283_v59 = vld [vmem:[%s1759_s7 + $0x30] sm:$0xff] }
 0x64e   :  { %900 = vmatpush.bf16.msra.mxu0 %v1283_v59 }
 0x651   :  { %742 = vmatpush.bf16.msrb.mxu2 %v1271_v60  ;;  %v1282_v60 = vld [vmem:[%s1759_s7 + $0x28] sm:$0xff] }
 0x652   :  { %901 = vmatpush.bf16.msra.mxu0 %v1282_v60 }
 0x6a2   :  { %v630_v44 = vpop.xlane.xlu2 %629 }
 0x6a3   :  { %v634_v45 = vsub.f32 %v624_v39, %v630_v44 }
 0x6a5   :  { %v636_v46 = vmul.f32 1.442695, %v634_v45 }
 0x6a7   :  { %1323 = vpow2.f32 %v636_v46 }
 0x6aa   :  { %v633_v47 = vpop.xlane.xlu1 %632 }
 0x6ab   :  { %v635_v48 = vsub.f32 %v626_v42, %v633_v47 }
 0x6ad   :  { %v1324_v49 = vpop.eup %1323  ;;  %v638_v50 = vmul.f32 1.442695, %v635_v48  ;;  %v1299_v48 = vld [vmem:[%s1754_s9 + $0x1] ss:$0 sm:$0xff] }
 0x6ae   :  { %v640_v51 = vsel %vm180_vm2, %v1324_v49, 0.0 }
 0x6af   :  { %1325 = vpow2.f32 %v638_v50  ;;  %641 = vadd.xlane.f32.xlu2 %v640_v51 }
 0x6b5   :  { %v1326_v33 = vpop.eup %1325 }
 0x6b6   :  { %v646_v52 = vpack.c.bf16 %v1326_v33, %v1324_v49  ;;  %v643_v53 = vsel %vm180_vm2, %v1326_v33, 0.0 }
 0x6b7   :  { %644 = vadd.xlane.f32.xlu1 %v643_v53 }
 0x6b8   :  { %1143 = vmatmul.msk.bf16.vlgmr.msra.gmra.mxu1 %vm180_vm2, %v646_v52  ;;  %v1294_v52 = vld [vmem:[%s1755_s10 + $0x1] ss:$0 sm:$0xff] }
 0x722   :  { %v642_v61 = vpop.xlane.xlu2 %641 }
 0x723   :  { %1327 = vrcp.f32 %v642_v61  ;;  %v1281_v61 = vld [vmem:[%s1759_s7 + $0x20] sm:$0xff] }
 0x724   :  { %902 = vmatpush.bf16.msra.mxu0 %v1281_v61 }
 0x729   :  { %v1328_v0 = vpop.eup %1327 }
 0x72a   :  { %v645_v62 = vpop.xlane.xlu1 %644 }
 0x72b   :  { %1329 = vrcp.f32 %v645_v62 }
 0x731   :  { %v1330_v1 = vpop.eup %1329 }
 0x735   :  { %v660_v63 = vpop.f32.mrf.mxu1 }
 0x736   :  { %v667_v3 = vmul.f32 %v1328_v0, %v660_v63  ;;  %v1300_v63 = vld [vmem:[%s1756_s6 + $0x1] ss:$0 sm:$0xff] }
 0x73d   :  { %v662_v2 = vpop.f32.mrf.mxu1 }
 0x73e   :  { %v668_v4 = vmul.f32 %v1330_v1, %v662_v2 }
 0x740   :  { %v669_v5 = vpack.c.bf16 %v668_v4, %v667_v3 }
 0x742   :  { %743 = vmatmul.bf16.vlgmr.msrb.gmra.mxu2 %v669_v5 }
 0x7c5   :  { %v744_v6 = vpop.f32.mrf.mxu2 }
 0x7c6   :  { %v745_v7 = vadd.f32 %v744_v6, %v1635_v24  ;;  %v1279_v24 = vld [vmem:[%s1757_s5 + $0x10] sm:$0xff]  ;;  %v1301_v6 = vld [vmem:[%s1758_s8 + $0x1] ss:$0 sm:$0xff] }
 0x7c7   :  { %844 = vmatpush.bf16.msrb.mxu3 %v1279_v24 }
 0x7c8   :  { %v753_v8 = vsel %vm118_vm0, %v745_v7, 0.0  ;;  %v761_v9 = vmul.f32 %v745_v7, %v745_v7 }
 0x7c9   :  { %754 = vadd.xlane.f32.xlu2 %v753_v8 }
 0x7ca   :  { %v763_v10 = vsel %vm118_vm0, %v761_v9, 0.0 }
 0x7cb   :  { %764 = vadd.xlane.f32.xlu1 %v763_v10 }
 0x7cd   :  { %v746_v13 = vpop.f32.mrf.mxu2 }
 0x7ce   :  { %v747_v14 = vadd.f32 %v746_v13, %v1637_v25 }
 0x7d0   :  { %v756_v15 = vsel %vm118_vm0, %v747_v14, 0.0  ;;  %v762_v16 = vmul.f32 %v747_v14, %v747_v14 }
 0x7d1   :  { %757 = vadd.xlane.f32.xlu0 %v756_v15 }
 0x7d2   :  { %v766_v17 = vsel %vm118_vm0, %v762_v16, 0.0 }
 0x7d3   :  { %767 = vadd.xlane.f32.xlu2 %v766_v17 }
 0x83c   :  { %v755_v18 = vpop.xlane.xlu2 %754 }
 0x83d   :  { %v759_v11 = vmul.f32 %v755_v18, %v1533_v12 }
 0x83e   :  { %v765_v19 = vpop.xlane.xlu1 %764 }
 0x83f   :  { %v771_v20 = vmul.f32 %v759_v11, %v759_v11  ;;  %v769_v22 = vmul.f32 %v765_v19, %v1533_v12  ;;  %v775_v46 = vsub.f32 %v745_v7, %v759_v11 }
 0x841   :  { %v773_v21 = vsub.f32 %v769_v22, %v771_v20 }
 0x843   :  { %v777_v25 = vadd.f32 1e-05, %v773_v21 }
 0x844   :  { %v758_v27 = vpop.xlane.xlu0 %757 }
 0x845   :  { %1331 = vrsqrt.f32 %v777_v25  ;;  %v760_v26 = vmul.f32 %v758_v27, %v1533_v12  ;;  %vm785_vm4 = vweird.f32 %v777_v25 }
 0x846   :  { %v768_v28 = vpop.xlane.xlu2 %767 }
 0x847   :  { %v772_v29 = vmul.f32 %v760_v26, %v760_v26  ;;  %v770_v30 = vmul.f32 %v768_v28, %v1533_v12  ;;  %v776_v51 = vsub.f32 %v747_v14, %v760_v26 }
 0x849   :  { %v774_v31 = vsub.f32 %v770_v30, %v772_v29  ;;  %v1286_v29 = vld [vmem:[%s1763_s13 + $0x8] sm:$0xff] }
 0x84a   :  { %1008 = vmatpush.bf16.msrb.mxu1 %v1286_v29 }
 0x84b   :  { %v1332_v32 = vpop.eup %1331  ;;  %v778_v34 = vadd.f32 1e-05, %v774_v31 }
 0x84c   :  { %v780_v35 = vmul.f32 %v1332_v32, %v777_v25  ;;  %vm786_vm2 = vweird.f32 %v1332_v32 }
 0x84d   :  { %1333 = vrsqrt.f32 %v778_v34  ;;  %vm787_vm5 = vmor %vm785_vm4, %vm786_vm2  ;;  %vm795_vm7 = vweird.f32 %v778_v34 }
 0x84e   :  { %v781_v36 = vmul.f32 %v1332_v32, %v780_v35 }
 0x850   :  { %v782_v37 = vmul.f32 0.5, %v781_v36 }
 0x852   :  { %v783_v39 = vsub.f32 1.5, %v782_v37 }
 0x853   :  { %v1334_v40 = vpop.eup %1333 }
 0x854   :  { %v784_v41 = vmul.f32 %v1332_v32, %v783_v39  ;;  %v790_v42 = vmul.f32 %v1334_v40, %v778_v34  ;;  %vm796_vm6 = vweird.f32 %v1334_v40  ;;  %v1285_v34 = vld [vmem:[%s1763_s13] sm:$0xff] }
 0x855   :  { %vm797_vm8 = vmor %vm795_vm7, %vm796_vm6  ;;  %1009 = vmatpush.bf16.msrb.mxu1 %v1285_v34 }
 0x856   :  { %v791_v43 = vmul.f32 %v1334_v40, %v790_v42  ;;  %v788_v44 = vsel %vm787_vm5, %v1332_v32, %v784_v41 }
 0x857   :  { %v799_v49 = vmul.f32 %v788_v44, %v775_v46  ;;  %v1302_v46 = vld [vmem:[%s1760_s11 + $0x1] ss:$0 sm:$0xff] }
 0x858   :  { %v792_v45 = vmul.f32 0.5, %v791_v43 }
 0x859   :  { %v804_v53 = vmul.f32 %v1299_v48, %v799_v49  ;;  %v1303_v49 = vld [vmem:[%s1761_s12 + $0x1] ss:$0 sm:$0xff] }
 0x85a   :  { %v793_v47 = vsub.f32 1.5, %v792_v45 }
 0x85b   :  { %v809_v55 = vadd.f32 %v1294_v52, %v804_v53 }
 0x85c   :  { %v794_v50 = vmul.f32 %v1334_v40, %v793_v47 }
 0x85e   :  { %v798_v33 = vsel %vm797_vm8, %v1334_v40, %v794_v50 }
 0x85f   :  { %v800_v38 = vmul.f32 %v798_v33, %v776_v51 }
 0x861   :  { %v805_v54 = vmul.f32 %v1299_v48, %v800_v38 }
 0x863   :  { %v810_v56 = vadd.f32 %v1294_v52, %v805_v54 }
 0x865   :  { %v811_v57 = vpack.c.bf16 %v810_v56, %v809_v55 }
 0x867   :  { %1207 = vmatmul.msk.bf16.vlgmr.msrb.gmra.mxu3 %vm118_vm0, %v811_v57 }
 0x8ea   :  { %v846_v62 = vpop.f32.mrf.mxu3 }
 0x8eb   :  { %v847_v0 = vadd.f32 %v1300_v63, %v846_v62  ;;  %v1304_v62 = vld [vmem:[%s1762_s14] ss:$0 sm:$0xff] }
 0x8ed   :  { %v851_v3 = vmax.f32 %v847_v0, 0.0 }
 0x8f2   :  { %v848_v1 = vpop.f32.mrf.mxu3 }
 0x8f3   :  { %v849_v2 = vadd.f32 %v1300_v63, %v848_v1 }
 0x8f5   :  { %v852_v4 = vmax.f32 %v849_v2, 0.0 }
 0x8f7   :  { %v853_v5 = vpack.c.bf16 %v852_v4, %v851_v3 }
 0x8f9   :  { %1233 = vmatmul.msk.bf16.vlgmr.msra.gmra.mxu0 %vm445_vm11, %v853_v5 }
 0x976   :  { %v904_v7 = vpop.f32.mrf.mxu0 }
 0x977   :  { %v905_v8 = vadd.f32 %v1301_v6, %v904_v7 }
 0x979   :  { %v909_v9 = vadd.f32 %v905_v8, %v809_v55 }
 0x97b   :  { %v915_v10 = vsel %vm118_vm0, %v909_v9, 0.0  ;;  %v923_v13 = vmul.f32 %v909_v9, %v909_v9 }
 0x97c   :  { %916 = vadd.xlane.f32.xlu0 %v915_v10 }
 0x97d   :  { %v925_v14 = vsel %vm118_vm0, %v923_v13, 0.0 }
 0x97e   :  { %v906_v15 = vpop.f32.mrf.mxu0  ;;  %926 = vadd.xlane.f32.xlu2 %v925_v14 }
 0x97f   :  { %v907_v16 = vadd.f32 %v1301_v6, %v906_v15 }
 0x981   :  { %v910_v17 = vadd.f32 %v907_v16, %v810_v56 }
 0x983   :  { %v918_v18 = vsel %vm118_vm0, %v910_v17, 0.0  ;;  %v924_v11 = vmul.f32 %v910_v17, %v910_v17 }
 0x984   :  { %919 = vadd.xlane.f32.xlu1 %v918_v18 }
 0x985   :  { %v928_v19 = vsel %vm118_vm0, %v924_v11, 0.0 }
 0x986   :  { %929 = vadd.xlane.f32.xlu0 %v928_v19 }
 0x9ef   :  { %v917_v20 = vpop.xlane.xlu0 %916 }
 0x9f0   :  { %v921_v22 = vmul.f32 %v917_v20, %v1533_v12 }
 0x9f1   :  { %v927_v23 = vpop.xlane.xlu2 %926 }
 0x9f2   :  { %v933_v21 = vmul.f32 %v921_v22, %v921_v22  ;;  %v931_v24 = vmul.f32 %v927_v23, %v1533_v12 }
 0x9f4   :  { %v935_v25 = vsub.f32 %v931_v24, %v933_v21 }
 0x9f6   :  { %v939_v27 = vadd.f32 1e-05, %v935_v25 }
 0x9f7   :  { %v920_v26 = vpop.xlane.xlu1 %919 }
 0x9f8   :  { %1335 = vrsqrt.f32 %v939_v27  ;;  %v922_v28 = vmul.f32 %v920_v26, %v1533_v12  ;;  %vm947_vm10 = vweird.f32 %v939_v27 }
 0x9f9   :  { %v930_v30 = vpop.xlane.xlu0 %929 }
 0x9fa   :  { %v934_v31 = vmul.f32 %v922_v28, %v922_v28  ;;  %v932_v32 = vmul.f32 %v930_v30, %v1533_v12  ;;  %v937_v12 = vsub.f32 %v909_v9, %v921_v22  ;;  %v938_v54 = vsub.f32 %v910_v17, %v922_v28 }
 0x9fc   :  { %v936_v35 = vsub.f32 %v932_v32, %v934_v31 }
 0x9fe   :  { %v1336_v36 = vpop.eup %1335  ;;  %v940_v37 = vadd.f32 1e-05, %v936_v35 }
 0x9ff   :  { %v942_v39 = vmul.f32 %v1336_v36, %v939_v27  ;;  %vm948_vm9 = vweird.f32 %v1336_v36 }
 0xa00   :  { %1337 = vrsqrt.f32 %v940_v37  ;;  %vm949_vm11 = vmor %vm947_vm10, %vm948_vm9  ;;  %vm957_vm13 = vweird.f32 %v940_v37 }
 0xa01   :  { %v943_v40 = vmul.f32 %v1336_v36, %v942_v39 }
 0xa03   :  { %v944_v41 = vmul.f32 0.5, %v943_v40 }
 0xa05   :  { %v945_v42 = vsub.f32 1.5, %v944_v41 }
 0xa06   :  { %v1338_v43 = vpop.eup %1337 }
 0xa07   :  { %v946_v44 = vmul.f32 %v1336_v36, %v945_v42  ;;  %v952_v45 = vmul.f32 %v1338_v43, %v940_v37  ;;  %vm958_vm12 = vweird.f32 %v1338_v43 }
 0xa08   :  { %vm959_vm14 = vmor %vm957_vm13, %vm958_vm12 }
 0xa09   :  { %v950_v47 = vsel %vm949_vm11, %v1336_v36, %v946_v44  ;;  %v953_v48 = vmul.f32 %v1338_v43, %v952_v45 }
 0xa0a   :  { %v961_v50 = vmul.f32 %v950_v47, %v937_v12 }
 0xa0b   :  { %v954_v51 = vmul.f32 0.5, %v953_v48 }
 0xa0c   :  { %v966_v33 = vmul.f32 %v1302_v46, %v961_v50 }
 0xa0d   :  { %v955_v52 = vsub.f32 1.5, %v954_v51 }
 0xa0e   :  { %v971_v53 = vadd.f32 %v1303_v49, %v966_v33 }
 0xa0f   :  { %v956_v38 = vmul.f32 %v1338_v43, %v955_v52 }
 0xa10   :  { %973 = vst.msk [vmem:[#allocation2] sm:$0xff] %vm118_vm0, %v971_v53 }
 0xa11   :  { %v960_v55 = vsel %vm959_vm14, %v1338_v43, %v956_v38 }
 0xa12   :  { %v962_v56 = vmul.f32 %v960_v55, %v938_v54 }
 0xa14   :  { %v967_v57 = vmul.f32 %v1302_v46, %v962_v56 }
 0xa16   :  { %v972_v58 = vadd.f32 %v1303_v49, %v967_v57 }
 0xa17   :  { %v975_v59 = vld [vmem:[#allocation2] sm:$0xff] }
 0xa18   :  { %974 = vst.msk [vmem:[#allocation2 + $0x8] sm:$0xff] %vm118_vm0, %v972_v58 }
 0xa1f   :  { %v976_v60 = vld [vmem:[#allocation2 + $0x8] sm:$0xff] }
 0xa20   :  { %v977_v61 = vpack.c.bf16 %v976_v60, %v975_v59 }
 0xa22   :  { %1244 = vmatmul.msk.bf16.vlgmr.msrb.gmra.mxu1 %vm118_vm0, %v977_v61 }
 0xa9f   :  { %v1011_v63 = vpop.f32.mrf.mxu1 }
 0xaa0   :  { %v1012_v0 = vadd.f32 %v1304_v62, %v1011_v63 }
 0xaa2   :  { %1016 = vst [vmem:[%s1764_s15] sm:$0xff] %v1012_v0 }
 0xaa7   :  { %v1013_v1 = vpop.f32.mrf.mxu1 }
 0xaa8   :  { %v1014_v2 = vadd.f32 %v1304_v62, %v1013_v1 }
 0xaaa   :  { %1017 = vst [vmem:[%s1764_s15 + $0x8] sm:$0xff] %v1014_v2 }

</bundles_post_ra>
